<compile_context>
chip_gen: v7x
topology: tpu7x:2x2x1
jax: 0.10.0
libtpu: 0.0.40
codegen_flags: <defaults>
</compile_context>

<pallas_src>
import math

import jax
import jax.numpy as jnp
from jax import lax
from jax.experimental import pallas as pl
from jax.experimental.pallas import tpu as pltpu

# Small, self-consistent hyper-parameters for RNNLM(vocab, embed, hidden, layers)
VOCAB = 128
EMBED = 32
HIDDEN = 32
LAYERS = 2
BATCH = 2
SEQ = 8


def _rnnlm_kernel(tok_ref,                      # [T*B, 1] int32, time-major flat ids
                  slab_ref,                     # [V+3H+16, 8H] f32 packed weights
                  h0_ref, c0_ref,               # [L, B, H] each
                  logits_ref,                   # [T*B, V] f32 out (lane-dense slab)
                  h_out_ref, c_out_ref):        # [L, B, H] out
    TB = tok_ref.shape[0]
    V = logits_ref.shape[1]
    _, B, H = h0_ref.shape
    T = TB // B
    G = 8 * H                                   # packed gate width (2 layers x 4 gates)

    # ---- static views into the packed weight slab (loaded once) ------------
    w_fused = slab_ref[0:V, :]                              # [V, 8H]  emb@W_ih0_big + b_big
    w_big   = slab_ref[V:V + 2 * H, :]                      # [2H, 8H] fused recurrent weight
    w_out   = slab_ref[V + 2 * H:V + 3 * H, 0:V]            # [H, V]
    b_out   = slab_ref[V + 3 * H:V + 3 * H + 1, 0:V]        # [1, V]
    b_big   = slab_ref[V + 3 * H + 8:V + 3 * H + 9, :]      # [1, 8H]

    # ---- fused embedding lookup + layer-0 input projection for ALL steps ---
    # one-hot(x) @ (embedding @ W_ih0_big + b_big): one [TB,V]@[V,8H] MXU pass;
    # both layers' biases come along for free in the table rows.
    tok = tok_ref[...]                                      # [TB, 1] int32
    onehot = (lax.broadcasted_iota(jnp.int32, (TB, V), 1) == tok).astype(jnp.float32)
    g0_all = jnp.dot(onehot, w_fused, preferred_element_type=jnp.float32)   # [TB, 8H]

    # ---- hoisted lane masks (JAX does not CSE broadcast_in_dim in loops) ---
    lane_g = lax.broadcasted_iota(jnp.int32, (B, G), 1)
    is_g = jnp.logical_and(lane_g >= 4 * H, lane_g < 6 * H)     # g-gate lanes
    lane_s = lax.broadcasted_iota(jnp.int32, (B, 2 * H), 1)
    is_l0 = lane_s < H                                          # layer-0 half of packed state

    # packed states: lanes [0,H) = layer 0, lanes [H,2H) = layer 1
    xh_init = jnp.concatenate([h0_ref[0], h0_ref[1]], axis=-1)  # [B, 2H]
    c_init = jnp.concatenate([c0_ref[0], c0_ref[1]], axis=-1)   # [B, 2H]

    def vstep(h_p, c_p, g0_row):
        # Single MXU push covering layer-0 @ step t AND layer-1 @ step t-1.
        gates = jnp.dot(h_p, w_big, preferred_element_type=jnp.float32) + g0_row
        # Whole-vreg activations for both layers at once (2 EUP pushes).
        act = jnp.where(is_g, jnp.tanh(gates), jax.nn.sigmoid(gates))
        i_p = act[:, 0 * H:2 * H]       # [i0|i1]
        f_p = act[:, 2 * H:4 * H]       # [f0|f1]
        g_p = act[:, 4 * H:6 * H]       # [g0|g1]
        o_p = act[:, 6 * H:8 * H]       # [o0|o1]
        c_new = f_p * c_p + i_p * g_p
        h_new = o_p * jnp.tanh(c_new)
        return h_new, c_new

    def emit_logits(h_l1, t):
        # Off the recurrent chain: project this step's layer-1 output and store
        # it lane-dense straight into the final logits slab (no VMEM scratch).
        y = jnp.dot(h_l1, w_out, preferred_element_type=jnp.float32) + b_out
        logits_ref[t * B:(t + 1) * B, :] = y

    # ---- diagonal pipeline over T+1 virtual steps (fully unrolled) ---------
    # virtual step s: layer-0 consumes token s, layer-1 consumes h_l0(s-1).
    h_p, c_p = xh_init, c_init

    # s = 0: layer-0 @ t=0 is real; the layer-1 half is a warm-up dummy, so
    # restore its lanes to the true initial state afterwards.
    h_p, c_p = vstep(h_p, c_p, g0_all[0:B, :])
    h_p = jnp.where(is_l0, h_p, xh_init)
    c_p = jnp.where(is_l0, c_p, c_init)

    # s = 1 .. T-1: steady state (layer-0 @ t=s, layer-1 @ t=s-1).
    for s in range(1, T):
        h_p, c_p = vstep(h_p, c_p, g0_all[s * B:(s + 1) * B, :])
        emit_logits(h_p[:, H:], s - 1)

    # Layer-0 final state (t = T-1) now sits in the layer-0 lanes.
    h_out_ref[0] = h_p[:, :H]
    c_out_ref[0] = c_p[:, :H]

    # s = T: drain — only the layer-1 half (t = T-1) is meaningful; its gate
    # bias still has to come in, so feed b_big as the "g0" row (the layer-0
    # half of this step is discarded).
    h_p, c_p = vstep(h_p, c_p, b_big)
    emit_logits(h_p[:, H:], T - 1)
    h_out_ref[1] = h_p[:, H:]
    c_out_ref[1] = c_p[:, H:]


def _pack_weight_slab(p):
    """Pack all weights/biases into one lane-dense [V+3H+16, 8H] f32 slab.

    Column layout of the 8H gate axis is per-gate interleaved:
      [i_l0 i_l1 f_l0 f_l1 g_l0 g_l1 o_l0 o_l1], each block H wide.
    Row layout:
      [0,     V)      : embedding @ W_ih0_big + b_big   (per-token layer-0 gates)
      [V,     V+2H)   : W_big  (rows 0:H hit h_l0, rows H:2H hit h_l1)
      [V+2H,  V+3H)   : W_out in cols [0, V)
      row V+3H        : b_out in cols [0, V)
      row V+3H+8      : b_big (sublane-aligned)
    """
    H, V, E = HIDDEN, VOCAB, EMBED
    zeros4h = lambda rows: jnp.zeros((rows, 4 * H), jnp.float32)

    def interleave(l0, l1):
        parts = []
        for k in range(4):                       # gate order i, f, g, o
            parts.append(l0[..., k * H:(k + 1) * H])
            parts.append(l1[..., k * H:(k + 1) * H])
        return jnp.concatenate(parts, axis=-1)

    w_big = jnp.concatenate(
        [interleave(p["w_hh0"], p["w_ih1"]),          # rows multiplied by h_l0
         interleave(zeros4h(H), p["w_hh1"])],         # rows multiplied by h_l1
        axis=0)                                       # [2H, 8H]
    w_ih0_big = interleave(p["w_ih0"], zeros4h(E))    # [E, 8H]
    b_big = interleave(p["b0"], p["b1"])              # [1, 8H]
    w_fused = p["embedding"].astype(jnp.float32) @ w_ih0_big + b_big   # [V, 8H]

    rows = V + 3 * H + 16
    slab = jnp.zeros((rows, 8 * H), jnp.float32)
    slab = slab.at[0:V, :].set(w_fused)
    slab = slab.at[V:V + 2 * H, :].set(w_big)
    slab = slab.at[V + 2 * H:V + 3 * H, 0:V].set(p["w_out"])
    slab = slab.at[V + 3 * H, 0:V].set(p["b_out"][0])
    slab = slab.at[V + 3 * H + 8, :].set(b_big[0])
    return slab


def rnnlm_forward(x, hidden, params):
    """x: [B, T] int32 token ids; hidden: (h0, c0) each [L, B, H]."""
    h0, c0 = hidden
    B, T = x.shape
    # Time-major flattened token ids (tiny int glue; the embedding gather
    # itself is fused into the kernel as a one-hot matmul).
    tok = jnp.transpose(x).reshape(T * B, 1).astype(jnp.int32)

    vmem = pl.BlockSpec(memory_space=pltpu.MemorySpace.VMEM)
    logits_flat, h_out, c_out = pl.pallas_call(
        _rnnlm_kernel,
        out_shape=(
            jax.ShapeDtypeStruct((T * B, VOCAB), jnp.float32),
            jax.ShapeDtypeStruct((LAYERS, B, HIDDEN), jnp.float32),
            jax.ShapeDtypeStruct((LAYERS, B, HIDDEN), jnp.float32),
        ),
        in_specs=[vmem] * 4,
        out_specs=(vmem, vmem, vmem),
    )(tok, params["w_slab"], h0, c0)

    # [T*B, V] -> [T, B, V] -> batch_first [B, T, V]
    logits = jnp.transpose(logits_flat.reshape(T, B, VOCAB), (1, 0, 2))
    return logits, (h_out, c_out)


def init_params(key):
    """Deterministic init mirroring RNNLM.__init__ / init_weights shapes."""
    keys = jax.random.split(key, 10)
    initrange = 0.1
    k = 1.0 / math.sqrt(HIDDEN)   # PyTorch default LSTM init range

    def u(kk, shape, a):
        return jax.random.uniform(kk, shape, jnp.float32, -a, a)

    emb_w = u(keys[0], (VOCAB, EMBED), initrange)
    w_ih0 = u(keys[1], (4 * HIDDEN, EMBED), k)
    w_hh0 = u(keys[2], (4 * HIDDEN, HIDDEN), k)
    b_ih0 = u(keys[3], (4 * HIDDEN,), k)
    b_hh0 = u(keys[4], (4 * HIDDEN,), k)
    w_ih1 = u(keys[5], (4 * HIDDEN, HIDDEN), k)
    w_hh1 = u(keys[6], (4 * HIDDEN, HIDDEN), k)
    b_ih1 = u(keys[7], (4 * HIDDEN,), k)
    b_hh1 = u(keys[8], (4 * HIDDEN,), k)
    w_lin = u(keys[9], (VOCAB, HIDDEN), initrange)
    b_lin = jnp.zeros((VOCAB,), jnp.float32)

    params = {
        "embedding": emb_w,
        "w_ih0": w_ih0.T, "w_hh0": w_hh0.T, "b0": (b_ih0 + b_hh0)[None, :],
        "w_ih1": w_ih1.T, "w_hh1": w_hh1.T, "b1": (b_ih1 + b_hh1)[None, :],
        "w_out": w_lin.T, "b_out": b_lin[None, :],
    }
    # One-time host-side packing of everything the kernel needs into one slab.
    params["w_slab"] = _pack_weight_slab(params)
    return params


def rnnlm_reference(x, hidden, params):
    """Pure-JAX reference of the same forward (eval-mode dropout = identity)."""
    emb = jnp.take(params["embedding"], x, axis=0)            # [B, T, E]
    h0, c0 = hidden
    B, T, _ = emb.shape
    H = HIDDEN

    def cell(xv, h, c, w_ih, w_hh, b):
        g = xv @ w_ih + h @ w_hh + b
        i = jax.nn.sigmoid(g[:, :H])
        f = jax.nn.sigmoid(g[:, H:2 * H])
        gg = jnp.tanh(g[:, 2 * H:3 * H])
        o = jax.nn.sigmoid(g[:, 3 * H:])
        c = f * c + i * gg
        return o * jnp.tanh(c), c

    h_l0, c_l0, h_l1, c_l1 = h0[0], c0[0], h0[1], c0[1]
    hs = []
    for t in range(T):
        h_l0, c_l0 = cell(emb[:, t], h_l0, c_l0,
                          params["w_ih0"], params["w_hh0"], params["b0"])
        h_l1, c_l1 = cell(h_l0, h_l1, c_l1,
                          params["w_ih1"], params["w_hh1"], params["b1"])
        hs.append(h_l1)
    hs = jnp.stack(hs, axis=1)                                # [B, T, H]
    logits = hs.reshape(-1, H) @ params["w_out"] + params["b_out"]
    return (logits.reshape(B, T, VOCAB),
            (jnp.stack([h_l0, h_l1]), jnp.stack([c_l0, c_l1])))


if __name__ == "__main__":
    key = jax.random.PRNGKey(0)
    pkey, xkey, hkey, ckey = jax.random.split(key, 4)
    params = init_params(pkey)

    x = jax.random.randint(xkey, (BATCH, SEQ), 0, VOCAB, dtype=jnp.int32)
    # Non-zero initial hidden state to exercise the packed-state / final-state
    # paths (init_hidden() zeros would also work).
    hidden = (0.5 * jax.random.normal(hkey, (LAYERS, BATCH, HIDDEN), jnp.float32),
              0.5 * jax.random.normal(ckey, (LAYERS, BATCH, HIDDEN), jnp.float32))

    logits, (h_out, c_out) = rnnlm_forward(x, hidden, params)
    jax.block_until_ready((logits, h_out, c_out))

    ref_logits, (ref_h, ref_c) = rnnlm_reference(x, hidden, params)
    assert logits.shape == (BATCH, SEQ, VOCAB)
    assert h_out.shape == (LAYERS, BATCH, HIDDEN)
    assert c_out.shape == (LAYERS, BATCH, HIDDEN)
    assert jnp.allclose(logits, ref_logits, atol=1e-4, rtol=1e-4)
    assert jnp.allclose(h_out, ref_h, atol=1e-4, rtol=1e-4)
    assert jnp.allclose(c_out, ref_c, atol=1e-4, rtol=1e-4)

    print("KERNEL_OK")
</pallas_src>

<mosaic_0001>
module attributes {stable_mosaic.version = 11 : i64} {
  func.func @_rnnlm_kernel(%arg0: memref<16x1xi32, #tpu.memory_space<vmem>>, %arg1: memref<240x256xf32, #tpu.memory_space<vmem>>, %arg2: memref<2x2x32xf32, #tpu.memory_space<vmem>>, %arg3: memref<2x2x32xf32, #tpu.memory_space<vmem>>, %arg4: memref<16x128xf32, #tpu.memory_space<vmem>>, %arg5: memref<2x2x32xf32, #tpu.memory_space<vmem>>, %arg6: memref<2x2x32xf32, #tpu.memory_space<vmem>>) attributes {dimension_semantics = [], scalar_prefetch = 0 : i64, scratch_operands = 0 : i64, tpu.core_type = #tpu.core_type<tc>} {
    %c0 = arith.constant 0 : index
    %c0_0 = arith.constant 0 : index
    %0 = vector.load %arg1[%c0, %c0_0] : memref<240x256xf32, #tpu.memory_space<vmem>>, vector<128x256xf32>
    %c128 = arith.constant 128 : index
    %c0_1 = arith.constant 0 : index
    %1 = vector.load %arg1[%c128, %c0_1] : memref<240x256xf32, #tpu.memory_space<vmem>>, vector<64x256xf32>
    %c192 = arith.constant 192 : index
    %c0_2 = arith.constant 0 : index
    %2 = vector.load %arg1[%c192, %c0_2] : memref<240x256xf32, #tpu.memory_space<vmem>>, vector<32x128xf32>
    %c224 = arith.constant 224 : index
    %c0_3 = arith.constant 0 : index
    %3 = vector.load %arg1[%c224, %c0_3] : memref<240x256xf32, #tpu.memory_space<vmem>>, vector<1x128xf32>
    %c232 = arith.constant 232 : index
    %c0_4 = arith.constant 0 : index
    %4 = vector.load %arg1[%c232, %c0_4] : memref<240x256xf32, #tpu.memory_space<vmem>>, vector<1x256xf32>
    %c0_5 = arith.constant 0 : index
    %c0_6 = arith.constant 0 : index
    %5 = vector.load %arg0[%c0_5, %c0_6] : memref<16x1xi32, #tpu.memory_space<vmem>>, vector<16x1xi32>
    %6 = tpu.iota {dimensions = array<i32: 1>} : vector<16x128xi32>
    %7 = vector.broadcast %5 : vector<16x1xi32> to vector<16x128xi32>
    %8 = arith.cmpi eq, %6, %7 : vector<16x128xi32>
    %9 = arith.extui %8 : vector<16x128xi1> to vector<16x128xi32>
    %10 = arith.sitofp %9 : vector<16x128xi32> to vector<16x128xf32>
    %cst = arith.constant dense<0.000000e+00> : vector<16x256xf32>
    %11 = tpu.matmul %10, %0, %cst {dimension_numbers = #tpu.dot_dimension_numbers<[1], [0], [0], [1], [0, 0, 1, 1], [], []>} : vector<16x128xf32>, vector<128x256xf32>, vector<16x256xf32> -> vector<16x256xf32>
    %12 = tpu.iota {dimensions = array<i32: 1>} : vector<2x256xi32>
    %c128_i32 = arith.constant 128 : i32
    %13 = vector.broadcast %c128_i32 : i32 to vector<2x256xi32>
    %14 = arith.cmpi sge, %12, %13 : vector<2x256xi32>
    %c192_i32 = arith.constant 192 : i32
    %15 = vector.broadcast %c192_i32 : i32 to vector<2x256xi32>
    %16 = arith.cmpi slt, %12, %15 : vector<2x256xi32>
    %17 = arith.andi %14, %16 : vector<2x256xi1>
    %18 = tpu.iota {dimensions = array<i32: 1>} : vector<2x64xi32>
    %c32_i32 = arith.constant 32 : i32
    %19 = vector.broadcast %c32_i32 : i32 to vector<2x64xi32>
    %20 = arith.cmpi slt, %18, %19 : vector<2x64xi32>
    %c0_7 = arith.constant 0 : index
    %c0_8 = arith.constant 0 : index
    %c0_9 = arith.constant 0 : index
    %21 = vector.load %arg2[%c0_7, %c0_8, %c0_9] : memref<2x2x32xf32, #tpu.memory_space<vmem>>, vector<1x2x32xf32>
    %22 = vector.shape_cast %21 : vector<1x2x32xf32> to vector<2x32xf32>
    %c1 = arith.constant 1 : index
    %c0_10 = arith.constant 0 : index
    %c0_11 = arith.constant 0 : index
    %23 = vector.load %arg2[%c1, %c0_10, %c0_11] : memref<2x2x32xf32, #tpu.memory_space<vmem>>, vector<1x2x32xf32>
    %24 = vector.shape_cast %23 : vector<1x2x32xf32> to vector<2x32xf32>
    %25 = tpu.concatenate %22, %24 in 1 : vector<2x32xf32>, vector<2x32xf32> -> vector<2x64xf32>
    %c0_12 = arith.constant 0 : index
    %c0_13 = arith.constant 0 : index
    %c0_14 = arith.constant 0 : index
    %26 = vector.load %arg3[%c0_12, %c0_13, %c0_14] : memref<2x2x32xf32, #tpu.memory_space<vmem>>, vector<1x2x32xf32>
    %27 = vector.shape_cast %26 : vector<1x2x32xf32> to vector<2x32xf32>
    %c1_15 = arith.constant 1 : index
    %c0_16 = arith.constant 0 : index
    %c0_17 = arith.constant 0 : index
    %28 = vector.load %arg3[%c1_15, %c0_16, %c0_17] : memref<2x2x32xf32, #tpu.memory_space<vmem>>, vector<1x2x32xf32>
    %29 = vector.shape_cast %28 : vector<1x2x32xf32> to vector<2x32xf32>
    %30 = tpu.concatenate %27, %29 in 1 : vector<2x32xf32>, vector<2x32xf32> -> vector<2x64xf32>
    %31 = vector.extract_strided_slice %11 {offsets = [0, 0], sizes = [2, 256], strides = [1, 1]} : vector<16x256xf32> to vector<2x256xf32>
    %cst_18 = arith.constant dense<0.000000e+00> : vector<2x256xf32>
    %32 = tpu.matmul %25, %1, %cst_18 {dimension_numbers = #tpu.dot_dimension_numbers<[1], [0], [0], [1], [0, 0, 1, 1], [], []>} : vector<2x64xf32>, vector<64x256xf32>, vector<2x256xf32> -> vector<2x256xf32>
    %33 = arith.addf %32, %31 : vector<2x256xf32>
    %34 = math.tanh %33 : vector<2x256xf32>
    %35 = arith.negf %33 : vector<2x256xf32>
    %36 = math.exp %35 : vector<2x256xf32>
    %cst_19 = arith.constant 1.000000e+00 : f32
    %37 = vector.broadcast %cst_19 : f32 to vector<2x256xf32>
    %38 = arith.addf %37, %36 : vector<2x256xf32>
    %39 = arith.divf %37, %38 : vector<2x256xf32>
    %40 = arith.select %17, %34, %39 : vector<2x256xi1>, vector<2x256xf32>
    %41 = vector.extract_strided_slice %40 {offsets = [0, 0], sizes = [2, 64], strides = [1, 1]} : vector<2x256xf32> to vector<2x64xf32>
    %42 = vector.extract_strided_slice %40 {offsets = [0, 64], sizes = [2, 64], strides = [1, 1]} : vector<2x256xf32> to vector<2x64xf32>
    %43 = vector.extract_strided_slice %40 {offsets = [0, 128], sizes = [2, 64], strides = [1, 1]} : vector<2x256xf32> to vector<2x64xf32>
    %44 = vector.extract_strided_slice %40 {offsets = [0, 192], sizes = [2, 64], strides = [1, 1]} : vector<2x256xf32> to vector<2x64xf32>
    %45 = arith.mulf %42, %30 : vector<2x64xf32>
    %46 = arith.mulf %41, %43 : vector<2x64xf32>
    %47 = arith.addf %45, %46 : vector<2x64xf32>
    %48 = math.tanh %47 : vector<2x64xf32>
    %49 = arith.mulf %44, %48 : vector<2x64xf32>
    %50 = arith.select %20, %49, %25 : vector<2x64xi1>, vector<2x64xf32>
    %51 = arith.select %20, %47, %30 : vector<2x64xi1>, vector<2x64xf32>
    %52 = vector.extract_strided_slice %11 {offsets = [2, 0], sizes = [2, 256], strides = [1, 1]} : vector<16x256xf32> to vector<2x256xf32>
    %cst_20 = arith.constant dense<0.000000e+00> : vector<2x256xf32>
    %53 = tpu.matmul %50, %1, %cst_20 {dimension_numbers = #tpu.dot_dimension_numbers<[1], [0], [0], [1], [0, 0, 1, 1], [], []>} : vector<2x64xf32>, vector<64x256xf32>, vector<2x256xf32> -> vector<2x256xf32>
    %54 = arith.addf %53, %52 : vector<2x256xf32>
    %55 = math.tanh %54 : vector<2x256xf32>
    %56 = arith.negf %54 : vector<2x256xf32>
    %57 = math.exp %56 : vector<2x256xf32>
    %cst_21 = arith.constant 1.000000e+00 : f32
    %58 = vector.broadcast %cst_21 : f32 to vector<2x256xf32>
    %59 = arith.addf %58, %57 : vector<2x256xf32>
    %60 = arith.divf %58, %59 : vector<2x256xf32>
    %61 = arith.select %17, %55, %60 : vector<2x256xi1>, vector<2x256xf32>
    %62 = vector.extract_strided_slice %61 {offsets = [0, 0], sizes = [2, 64], strides = [1, 1]} : vector<2x256xf32> to vector<2x64xf32>
    %63 = vector.extract_strided_slice %61 {offsets = [0, 64], sizes = [2, 64], strides = [1, 1]} : vector<2x256xf32> to vector<2x64xf32>
    %64 = vector.extract_strided_slice %61 {offsets = [0, 128], sizes = [2, 64], strides = [1, 1]} : vector<2x256xf32> to vector<2x64xf32>
    %65 = vector.extract_strided_slice %61 {offsets = [0, 192], sizes = [2, 64], strides = [1, 1]} : vector<2x256xf32> to vector<2x64xf32>
    %66 = arith.mulf %63, %51 : vector<2x64xf32>
    %67 = arith.mulf %62, %64 : vector<2x64xf32>
    %68 = arith.addf %66, %67 : vector<2x64xf32>
    %69 = math.tanh %68 : vector<2x64xf32>
    %70 = arith.mulf %65, %69 : vector<2x64xf32>
    %71 = vector.extract_strided_slice %70 {offsets = [0, 32], sizes = [2, 32], strides = [1, 1]} : vector<2x64xf32> to vector<2x32xf32>
    %cst_22 = arith.constant dense<0.000000e+00> : vector<2x128xf32>
    %72 = tpu.matmul %71, %2, %cst_22 {dimension_numbers = #tpu.dot_dimension_numbers<[1], [0], [0], [1], [0, 0, 1, 1], [], []>} : vector<2x32xf32>, vector<32x128xf32>, vector<2x128xf32> -> vector<2x128xf32>
    %73 = vector.broadcast %3 : vector<1x128xf32> to vector<2x128xf32>
    %74 = arith.addf %72, %73 : vector<2x128xf32>
    %c0_23 = arith.constant 0 : index
    %c0_24 = arith.constant 0 : index
    %75 = vector.load %arg4[%c0_23, %c0_24] : memref<16x128xf32, #tpu.memory_space<vmem>>, vector<2x128xf32>
    tpu.vector_store %arg4[%c0_23, %c0_24], %74 {strides = array<i32>} : memref<16x128xf32, #tpu.memory_space<vmem>>, vector<2x128xf32>,
    %76 = vector.extract_strided_slice %11 {offsets = [4, 0], sizes = [2, 256], strides = [1, 1]} : vector<16x256xf32> to vector<2x256xf32>
    %cst_25 = arith.constant dense<0.000000e+00> : vector<2x256xf32>
    %77 = tpu.matmul %70, %1, %cst_25 {dimension_numbers = #tpu.dot_dimension_numbers<[1], [0], [0], [1], [0, 0, 1, 1], [], []>} : vector<2x64xf32>, vector<64x256xf32>, vector<2x256xf32> -> vector<2x256xf32>
    %78 = arith.addf %77, %76 : vector<2x256xf32>
    %79 = math.tanh %78 : vector<2x256xf32>
    %80 = arith.negf %78 : vector<2x256xf32>
    %81 = math.exp %80 : vector<2x256xf32>
    %cst_26 = arith.constant 1.000000e+00 : f32
    %82 = vector.broadcast %cst_26 : f32 to vector<2x256xf32>
    %83 = arith.addf %82, %81 : vector<2x256xf32>
    %84 = arith.divf %82, %83 : vector<2x256xf32>
    %85 = arith.select %17, %79, %84 : vector<2x256xi1>, vector<2x256xf32>
    %86 = vector.extract_strided_slice %85 {offsets = [0, 0], sizes = [2, 64], strides = [1, 1]} : vector<2x256xf32> to vector<2x64xf32>
    %87 = vector.extract_strided_slice %85 {offsets = [0, 64], sizes = [2, 64], strides = [1, 1]} : vector<2x256xf32> to vector<2x64xf32>
    %88 = vector.extract_strided_slice %85 {offsets = [0, 128], sizes = [2, 64], strides = [1, 1]} : vector<2x256xf32> to vector<2x64xf32>
    %89 = vector.extract_strided_slice %85 {offsets = [0, 192], sizes = [2, 64], strides = [1, 1]} : vector<2x256xf32> to vector<2x64xf32>
    %90 = arith.mulf %87, %68 : vector<2x64xf32>
    %91 = arith.mulf %86, %88 : vector<2x64xf32>
    %92 = arith.addf %90, %91 : vector<2x64xf32>
    %93 = math.tanh %92 : vector<2x64xf32>
    %94 = arith.mulf %89, %93 : vector<2x64xf32>
    %95 = vector.extract_strided_slice %94 {offsets = [0, 32], sizes = [2, 32], strides = [1, 1]} : vector<2x64xf32> to vector<2x32xf32>
    %cst_27 = arith.constant dense<0.000000e+00> : vector<2x128xf32>
    %96 = tpu.matmul %95, %2, %cst_27 {dimension_numbers = #tpu.dot_dimension_numbers<[1], [0], [0], [1], [0, 0, 1, 1], [], []>} : vector<2x32xf32>, vector<32x128xf32>, vector<2x128xf32> -> vector<2x128xf32>
    %97 = vector.broadcast %3 : vector<1x128xf32> to vector<2x128xf32>
    %98 = arith.addf %96, %97 : vector<2x128xf32>
    %c2 = arith.constant 2 : index
    %c0_28 = arith.constant 0 : index
    %99 = vector.load %arg4[%c2, %c0_28] : memref<16x128xf32, #tpu.memory_space<vmem>>, vector<2x128xf32>
    tpu.vector_store %arg4[%c2, %c0_28], %98 {strides = array<i32>} : memref<16x128xf32, #tpu.memory_space<vmem>>, vector<2x128xf32>,
    %100 = vector.extract_strided_slice %11 {offsets = [6, 0], sizes = [2, 256], strides = [1, 1]} : vector<16x256xf32> to vector<2x256xf32>
    %cst_29 = arith.constant dense<0.000000e+00> : vector<2x256xf32>
    %101 = tpu.matmul %94, %1, %cst_29 {dimension_numbers = #tpu.dot_dimension_numbers<[1], [0], [0], [1], [0, 0, 1, 1], [], []>} : vector<2x64xf32>, vector<64x256xf32>, vector<2x256xf32> -> vector<2x256xf32>
    %102 = arith.addf %101, %100 : vector<2x256xf32>
    %103 = math.tanh %102 : vector<2x256xf32>
    %104 = arith.negf %102 : vector<2x256xf32>
    %105 = math.exp %104 : vector<2x256xf32>
    %cst_30 = arith.constant 1.000000e+00 : f32
    %106 = vector.broadcast %cst_30 : f32 to vector<2x256xf32>
    %107 = arith.addf %106, %105 : vector<2x256xf32>
    %108 = arith.divf %106, %107 : vector<2x256xf32>
    %109 = arith.select %17, %103, %108 : vector<2x256xi1>, vector<2x256xf32>
    %110 = vector.extract_strided_slice %109 {offsets = [0, 0], sizes = [2, 64], strides = [1, 1]} : vector<2x256xf32> to vector<2x64xf32>
    %111 = vector.extract_strided_slice %109 {offsets = [0, 64], sizes = [2, 64], strides = [1, 1]} : vector<2x256xf32> to vector<2x64xf32>
    %112 = vector.extract_strided_slice %109 {offsets = [0, 128], sizes = [2, 64], strides = [1, 1]} : vector<2x256xf32> to vector<2x64xf32>
    %113 = vector.extract_strided_slice %109 {offsets = [0, 192], sizes = [2, 64], strides = [1, 1]} : vector<2x256xf32> to vector<2x64xf32>
    %114 = arith.mulf %111, %92 : vector<2x64xf32>
    %115 = arith.mulf %110, %112 : vector<2x64xf32>
    %116 = arith.addf %114, %115 : vector<2x64xf32>
    %117 = math.tanh %116 : vector<2x64xf32>
    %118 = arith.mulf %113, %117 : vector<2x64xf32>
    %119 = vector.extract_strided_slice %118 {offsets = [0, 32], sizes = [2, 32], strides = [1, 1]} : vector<2x64xf32> to vector<2x32xf32>
    %cst_31 = arith.constant dense<0.000000e+00> : vector<2x128xf32>
    %120 = tpu.matmul %119, %2, %cst_31 {dimension_numbers = #tpu.dot_dimension_numbers<[1], [0], [0], [1], [0, 0, 1, 1], [], []>} : vector<2x32xf32>, vector<32x128xf32>, vector<2x128xf32> -> vector<2x128xf32>
    %121 = vector.broadcast %3 : vector<1x128xf32> to vector<2x128xf32>
    %122 = arith.addf %120, %121 : vector<2x128xf32>
    %c4 = arith.constant 4 : index
    %c0_32 = arith.constant 0 : index
    %123 = vector.load %arg4[%c4, %c0_32] : memref<16x128xf32, #tpu.memory_space<vmem>>, vector<2x128xf32>
    tpu.vector_store %arg4[%c4, %c0_32], %122 {strides = array<i32>} : memref<16x128xf32, #tpu.memory_space<vmem>>, vector<2x128xf32>,
    %124 = vector.extract_strided_slice %11 {offsets = [8, 0], sizes = [2, 256], strides = [1, 1]} : vector<16x256xf32> to vector<2x256xf32>
    %cst_33 = arith.constant dense<0.000000e+00> : vector<2x256xf32>
    %125 = tpu.matmul %118, %1, %cst_33 {dimension_numbers = #tpu.dot_dimension_numbers<[1], [0], [0], [1], [0, 0, 1, 1], [], []>} : vector<2x64xf32>, vector<64x256xf32>, vector<2x256xf32> -> vector<2x256xf32>
    %126 = arith.addf %125, %124 : vector<2x256xf32>
    %127 = math.tanh %126 : vector<2x256xf32>
    %128 = arith.negf %126 : vector<2x256xf32>
    %129 = math.exp %128 : vector<2x256xf32>
    %cst_34 = arith.constant 1.000000e+00 : f32
    %130 = vector.broadcast %cst_34 : f32 to vector<2x256xf32>
    %131 = arith.addf %130, %129 : vector<2x256xf32>
    %132 = arith.divf %130, %131 : vector<2x256xf32>
    %133 = arith.select %17, %127, %132 : vector<2x256xi1>, vector<2x256xf32>
    %134 = vector.extract_strided_slice %133 {offsets = [0, 0], sizes = [2, 64], strides = [1, 1]} : vector<2x256xf32> to vector<2x64xf32>
    %135 = vector.extract_strided_slice %133 {offsets = [0, 64], sizes = [2, 64], strides = [1, 1]} : vector<2x256xf32> to vector<2x64xf32>
    %136 = vector.extract_strided_slice %133 {offsets = [0, 128], sizes = [2, 64], strides = [1, 1]} : vector<2x256xf32> to vector<2x64xf32>
    %137 = vector.extract_strided_slice %133 {offsets = [0, 192], sizes = [2, 64], strides = [1, 1]} : vector<2x256xf32> to vector<2x64xf32>
    %138 = arith.mulf %135, %116 : vector<2x64xf32>
    %139 = arith.mulf %134, %136 : vector<2x64xf32>
    %140 = arith.addf %138, %139 : vector<2x64xf32>
    %141 = math.tanh %140 : vector<2x64xf32>
    %142 = arith.mulf %137, %141 : vector<2x64xf32>
    %143 = vector.extract_strided_slice %142 {offsets = [0, 32], sizes = [2, 32], strides = [1, 1]} : vector<2x64xf32> to vector<2x32xf32>
    %cst_35 = arith.constant dense<0.000000e+00> : vector<2x128xf32>
    %144 = tpu.matmul %143, %2, %cst_35 {dimension_numbers = #tpu.dot_dimension_numbers<[1], [0], [0], [1], [0, 0, 1, 1], [], []>} : vector<2x32xf32>, vector<32x128xf32>, vector<2x128xf32> -> vector<2x128xf32>
    %145 = vector.broadcast %3 : vector<1x128xf32> to vector<2x128xf32>
    %146 = arith.addf %144, %145 : vector<2x128xf32>
    %c6 = arith.constant 6 : index
    %c0_36 = arith.constant 0 : index
    %147 = vector.load %arg4[%c6, %c0_36] : memref<16x128xf32, #tpu.memory_space<vmem>>, vector<2x128xf32>
    tpu.vector_store %arg4[%c6, %c0_36], %146 {strides = array<i32>} : memref<16x128xf32, #tpu.memory_space<vmem>>, vector<2x128xf32>,
    %148 = vector.extract_strided_slice %11 {offsets = [10, 0], sizes = [2, 256], strides = [1, 1]} : vector<16x256xf32> to vector<2x256xf32>
    %cst_37 = arith.constant dense<0.000000e+00> : vector<2x256xf32>
    %149 = tpu.matmul %142, %1, %cst_37 {dimension_numbers = #tpu.dot_dimension_numbers<[1], [0], [0], [1], [0, 0, 1, 1], [], []>} : vector<2x64xf32>, vector<64x256xf32>, vector<2x256xf32> -> vector<2x256xf32>
    %150 = arith.addf %149, %148 : vector<2x256xf32>
    %151 = math.tanh %150 : vector<2x256xf32>
    %152 = arith.negf %150 : vector<2x256xf32>
    %153 = math.exp %152 : vector<2x256xf32>
    %cst_38 = arith.constant 1.000000e+00 : f32
    %154 = vector.broadcast %cst_38 : f32 to vector<2x256xf32>
    %155 = arith.addf %154, %153 : vector<2x256xf32>
    %156 = arith.divf %154, %155 : vector<2x256xf32>
    %157 = arith.select %17, %151, %156 : vector<2x256xi1>, vector<2x256xf32>
    %158 = vector.extract_strided_slice %157 {offsets = [0, 0], sizes = [2, 64], strides = [1, 1]} : vector<2x256xf32> to vector<2x64xf32>
    %159 = vector.extract_strided_slice %157 {offsets = [0, 64], sizes = [2, 64], strides = [1, 1]} : vector<2x256xf32> to vector<2x64xf32>
    %160 = vector.extract_strided_slice %157 {offsets = [0, 128], sizes = [2, 64], strides = [1, 1]} : vector<2x256xf32> to vector<2x64xf32>
    %161 = vector.extract_strided_slice %157 {offsets = [0, 192], sizes = [2, 64], strides = [1, 1]} : vector<2x256xf32> to vector<2x64xf32>
    %162 = arith.mulf %159, %140 : vector<2x64xf32>
    %163 = arith.mulf %158, %160 : vector<2x64xf32>
    %164 = arith.addf %162, %163 : vector<2x64xf32>
    %165 = math.tanh %164 : vector<2x64xf32>
    %166 = arith.mulf %161, %165 : vector<2x64xf32>
    %167 = vector.extract_strided_slice %166 {offsets = [0, 32], sizes = [2, 32], strides = [1, 1]} : vector<2x64xf32> to vector<2x32xf32>
    %cst_39 = arith.constant dense<0.000000e+00> : vector<2x128xf32>
    %168 = tpu.matmul %167, %2, %cst_39 {dimension_numbers = #tpu.dot_dimension_numbers<[1], [0], [0], [1], [0, 0, 1, 1], [], []>} : vector<2x32xf32>, vector<32x128xf32>, vector<2x128xf32> -> vector<2x128xf32>
    %169 = vector.broadcast %3 : vector<1x128xf32> to vector<2x128xf32>
    %170 = arith.addf %168, %169 : vector<2x128xf32>
    %c8 = arith.constant 8 : index
    %c0_40 = arith.constant 0 : index
    %171 = vector.load %arg4[%c8, %c0_40] : memref<16x128xf32, #tpu.memory_space<vmem>>, vector<2x128xf32>
    tpu.vector_store %arg4[%c8, %c0_40], %170 {strides = array<i32>} : memref<16x128xf32, #tpu.memory_space<vmem>>, vector<2x128xf32>,
    %172 = vector.extract_strided_slice %11 {offsets = [12, 0], sizes = [2, 256], strides = [1, 1]} : vector<16x256xf32> to vector<2x256xf32>
    %cst_41 = arith.constant dense<0.000000e+00> : vector<2x256xf32>
    %173 = tpu.matmul %166, %1, %cst_41 {dimension_numbers = #tpu.dot_dimension_numbers<[1], [0], [0], [1], [0, 0, 1, 1], [], []>} : vector<2x64xf32>, vector<64x256xf32>, vector<2x256xf32> -> vector<2x256xf32>
    %174 = arith.addf %173, %172 : vector<2x256xf32>
    %175 = math.tanh %174 : vector<2x256xf32>
    %176 = arith.negf %174 : vector<2x256xf32>
    %177 = math.exp %176 : vector<2x256xf32>
    %cst_42 = arith.constant 1.000000e+00 : f32
    %178 = vector.broadcast %cst_42 : f32 to vector<2x256xf32>
    %179 = arith.addf %178, %177 : vector<2x256xf32>
    %180 = arith.divf %178, %179 : vector<2x256xf32>
    %181 = arith.select %17, %175, %180 : vector<2x256xi1>, vector<2x256xf32>
    %182 = vector.extract_strided_slice %181 {offsets = [0, 0], sizes = [2, 64], strides = [1, 1]} : vector<2x256xf32> to vector<2x64xf32>
    %183 = vector.extract_strided_slice %181 {offsets = [0, 64], sizes = [2, 64], strides = [1, 1]} : vector<2x256xf32> to vector<2x64xf32>
    %184 = vector.extract_strided_slice %181 {offsets = [0, 128], sizes = [2, 64], strides = [1, 1]} : vector<2x256xf32> to vector<2x64xf32>
    %185 = vector.extract_strided_slice %181 {offsets = [0, 192], sizes = [2, 64], strides = [1, 1]} : vector<2x256xf32> to vector<2x64xf32>
    %186 = arith.mulf %183, %164 : vector<2x64xf32>
    %187 = arith.mulf %182, %184 : vector<2x64xf32>
    %188 = arith.addf %186, %187 : vector<2x64xf32>
    %189 = math.tanh %188 : vector<2x64xf32>
    %190 = arith.mulf %185, %189 : vector<2x64xf32>
    %191 = vector.extract_strided_slice %190 {offsets = [0, 32], sizes = [2, 32], strides = [1, 1]} : vector<2x64xf32> to vector<2x32xf32>
    %cst_43 = arith.constant dense<0.000000e+00> : vector<2x128xf32>
    %192 = tpu.matmul %191, %2, %cst_43 {dimension_numbers = #tpu.dot_dimension_numbers<[1], [0], [0], [1], [0, 0, 1, 1], [], []>} : vector<2x32xf32>, vector<32x128xf32>, vector<2x128xf32> -> vector<2x128xf32>
    %193 = vector.broadcast %3 : vector<1x128xf32> to vector<2x128xf32>
    %194 = arith.addf %192, %193 : vector<2x128xf32>
    %c10 = arith.constant 10 : index
    %c0_44 = arith.constant 0 : index
    %195 = vector.load %arg4[%c10, %c0_44] : memref<16x128xf32, #tpu.memory_space<vmem>>, vector<2x128xf32>
    tpu.vector_store %arg4[%c10, %c0_44], %194 {strides = array<i32>} : memref<16x128xf32, #tpu.memory_space<vmem>>, vector<2x128xf32>,
    %196 = vector.extract_strided_slice %11 {offsets = [14, 0], sizes = [2, 256], strides = [1, 1]} : vector<16x256xf32> to vector<2x256xf32>
    %cst_45 = arith.constant dense<0.000000e+00> : vector<2x256xf32>
    %197 = tpu.matmul %190, %1, %cst_45 {dimension_numbers = #tpu.dot_dimension_numbers<[1], [0], [0], [1], [0, 0, 1, 1], [], []>} : vector<2x64xf32>, vector<64x256xf32>, vector<2x256xf32> -> vector<2x256xf32>
    %198 = arith.addf %197, %196 : vector<2x256xf32>
    %199 = math.tanh %198 : vector<2x256xf32>
    %200 = arith.negf %198 : vector<2x256xf32>
    %201 = math.exp %200 : vector<2x256xf32>
    %cst_46 = arith.constant 1.000000e+00 : f32
    %202 = vector.broadcast %cst_46 : f32 to vector<2x256xf32>
    %203 = arith.addf %202, %201 : vector<2x256xf32>
    %204 = arith.divf %202, %203 : vector<2x256xf32>
    %205 = arith.select %17, %199, %204 : vector<2x256xi1>, vector<2x256xf32>
    %206 = vector.extract_strided_slice %205 {offsets = [0, 0], sizes = [2, 64], strides = [1, 1]} : vector<2x256xf32> to vector<2x64xf32>
    %207 = vector.extract_strided_slice %205 {offsets = [0, 64], sizes = [2, 64], strides = [1, 1]} : vector<2x256xf32> to vector<2x64xf32>
    %208 = vector.extract_strided_slice %205 {offsets = [0, 128], sizes = [2, 64], strides = [1, 1]} : vector<2x256xf32> to vector<2x64xf32>
    %209 = vector.extract_strided_slice %205 {offsets = [0, 192], sizes = [2, 64], strides = [1, 1]} : vector<2x256xf32> to vector<2x64xf32>
    %210 = arith.mulf %207, %188 : vector<2x64xf32>
    %211 = arith.mulf %206, %208 : vector<2x64xf32>
    %212 = arith.addf %210, %211 : vector<2x64xf32>
    %213 = math.tanh %212 : vector<2x64xf32>
    %214 = arith.mulf %209, %213 : vector<2x64xf32>
    %215 = vector.extract_strided_slice %214 {offsets = [0, 32], sizes = [2, 32], strides = [1, 1]} : vector<2x64xf32> to vector<2x32xf32>
    %cst_47 = arith.constant dense<0.000000e+00> : vector<2x128xf32>
    %216 = tpu.matmul %215, %2, %cst_47 {dimension_numbers = #tpu.dot_dimension_numbers<[1], [0], [0], [1], [0, 0, 1, 1], [], []>} : vector<2x32xf32>, vector<32x128xf32>, vector<2x128xf32> -> vector<2x128xf32>
    %217 = vector.broadcast %3 : vector<1x128xf32> to vector<2x128xf32>
    %218 = arith.addf %216, %217 : vector<2x128xf32>
    %c12 = arith.constant 12 : index
    %c0_48 = arith.constant 0 : index
    %219 = vector.load %arg4[%c12, %c0_48] : memref<16x128xf32, #tpu.memory_space<vmem>>, vector<2x128xf32>
    tpu.vector_store %arg4[%c12, %c0_48], %218 {strides = array<i32>} : memref<16x128xf32, #tpu.memory_space<vmem>>, vector<2x128xf32>,
    %220 = vector.extract_strided_slice %214 {offsets = [0, 0], sizes = [2, 32], strides = [1, 1]} : vector<2x64xf32> to vector<2x32xf32>
    %c0_49 = arith.constant 0 : index
    %c0_50 = arith.constant 0 : index
    %c0_51 = arith.constant 0 : index
    %221 = vector.load %arg5[%c0_49, %c0_50, %c0_51] : memref<2x2x32xf32, #tpu.memory_space<vmem>>, vector<1x2x32xf32>
    %222 = vector.shape_cast %221 : vector<1x2x32xf32> to vector<2x32xf32>
    %223 = vector.shape_cast %220 : vector<2x32xf32> to vector<1x2x32xf32>
    tpu.vector_store %arg5[%c0_49, %c0_50, %c0_51], %223 {strides = array<i32>} : memref<2x2x32xf32, #tpu.memory_space<vmem>>, vector<1x2x32xf32>,
    %224 = vector.extract_strided_slice %212 {offsets = [0, 0], sizes = [2, 32], strides = [1, 1]} : vector<2x64xf32> to vector<2x32xf32>
    %c0_52 = arith.constant 0 : index
    %c0_53 = arith.constant 0 : index
    %c0_54 = arith.constant 0 : index
    %225 = vector.load %arg6[%c0_52, %c0_53, %c0_54] : memref<2x2x32xf32, #tpu.memory_space<vmem>>, vector<1x2x32xf32>
    %226 = vector.shape_cast %225 : vector<1x2x32xf32> to vector<2x32xf32>
    %227 = vector.shape_cast %224 : vector<2x32xf32> to vector<1x2x32xf32>
    tpu.vector_store %arg6[%c0_52, %c0_53, %c0_54], %227 {strides = array<i32>} : memref<2x2x32xf32, #tpu.memory_space<vmem>>, vector<1x2x32xf32>,
    %cst_55 = arith.constant dense<0.000000e+00> : vector<2x256xf32>
    %228 = tpu.matmul %214, %1, %cst_55 {dimension_numbers = #tpu.dot_dimension_numbers<[1], [0], [0], [1], [0, 0, 1, 1], [], []>} : vector<2x64xf32>, vector<64x256xf32>, vector<2x256xf32> -> vector<2x256xf32>
    %229 = vector.broadcast %4 : vector<1x256xf32> to vector<2x256xf32>
    %230 = arith.addf %228, %229 : vector<2x256xf32>
    %231 = math.tanh %230 : vector<2x256xf32>
    %232 = arith.negf %230 : vector<2x256xf32>
    %233 = math.exp %232 : vector<2x256xf32>
    %cst_56 = arith.constant 1.000000e+00 : f32
    %234 = vector.broadcast %cst_56 : f32 to vector<2x256xf32>
    %235 = arith.addf %234, %233 : vector<2x256xf32>
    %236 = arith.divf %234, %235 : vector<2x256xf32>
    %237 = arith.select %17, %231, %236 : vector<2x256xi1>, vector<2x256xf32>
    %238 = vector.extract_strided_slice %237 {offsets = [0, 0], sizes = [2, 64], strides = [1, 1]} : vector<2x256xf32> to vector<2x64xf32>
    %239 = vector.extract_strided_slice %237 {offsets = [0, 64], sizes = [2, 64], strides = [1, 1]} : vector<2x256xf32> to vector<2x64xf32>
    %240 = vector.extract_strided_slice %237 {offsets = [0, 128], sizes = [2, 64], strides = [1, 1]} : vector<2x256xf32> to vector<2x64xf32>
    %241 = vector.extract_strided_slice %237 {offsets = [0, 192], sizes = [2, 64], strides = [1, 1]} : vector<2x256xf32> to vector<2x64xf32>
    %242 = arith.mulf %239, %212 : vector<2x64xf32>
    %243 = arith.mulf %238, %240 : vector<2x64xf32>
    %244 = arith.addf %242, %243 : vector<2x64xf32>
    %245 = math.tanh %244 : vector<2x64xf32>
    %246 = arith.mulf %241, %245 : vector<2x64xf32>
    %247 = vector.extract_strided_slice %246 {offsets = [0, 32], sizes = [2, 32], strides = [1, 1]} : vector<2x64xf32> to vector<2x32xf32>
    %cst_57 = arith.constant dense<0.000000e+00> : vector<2x128xf32>
    %248 = tpu.matmul %247, %2, %cst_57 {dimension_numbers = #tpu.dot_dimension_numbers<[1], [0], [0], [1], [0, 0, 1, 1], [], []>} : vector<2x32xf32>, vector<32x128xf32>, vector<2x128xf32> -> vector<2x128xf32>
    %249 = vector.broadcast %3 : vector<1x128xf32> to vector<2x128xf32>
    %250 = arith.addf %248, %249 : vector<2x128xf32>
    %c14 = arith.constant 14 : index
    %c0_58 = arith.constant 0 : index
    %251 = vector.load %arg4[%c14, %c0_58] : memref<16x128xf32, #tpu.memory_space<vmem>>, vector<2x128xf32>
    tpu.vector_store %arg4[%c14, %c0_58], %250 {strides = array<i32>} : memref<16x128xf32, #tpu.memory_space<vmem>>, vector<2x128xf32>,
    %252 = vector.extract_strided_slice %246 {offsets = [0, 32], sizes = [2, 32], strides = [1, 1]} : vector<2x64xf32> to vector<2x32xf32>
    %c1_59 = arith.constant 1 : index
    %c0_60 = arith.constant 0 : index
    %c0_61 = arith.constant 0 : index
    %253 = vector.load %arg5[%c1_59, %c0_60, %c0_61] : memref<2x2x32xf32, #tpu.memory_space<vmem>>, vector<1x2x32xf32>
    %254 = vector.shape_cast %253 : vector<1x2x32xf32> to vector<2x32xf32>
    %255 = vector.shape_cast %252 : vector<2x32xf32> to vector<1x2x32xf32>
    tpu.vector_store %arg5[%c1_59, %c0_60, %c0_61], %255 {strides = array<i32>} : memref<2x2x32xf32, #tpu.memory_space<vmem>>, vector<1x2x32xf32>,
    %256 = vector.extract_strided_slice %244 {offsets = [0, 32], sizes = [2, 32], strides = [1, 1]} : vector<2x64xf32> to vector<2x32xf32>
    %c1_62 = arith.constant 1 : index
    %c0_63 = arith.constant 0 : index
    %c0_64 = arith.constant 0 : index
    %257 = vector.load %arg6[%c1_62, %c0_63, %c0_64] : memref<2x2x32xf32, #tpu.memory_space<vmem>>, vector<1x2x32xf32>
    %258 = vector.shape_cast %257 : vector<1x2x32xf32> to vector<2x32xf32>
    %259 = vector.shape_cast %256 : vector<2x32xf32> to vector<1x2x32xf32>
    tpu.vector_store %arg6[%c1_62, %c0_63, %c0_64], %259 {strides = array<i32>} : memref<2x2x32xf32, #tpu.memory_space<vmem>>, vector<1x2x32xf32>,
    return
  }
}

</mosaic_0001>

<bundles_post_ra>
// kernel: tpu_custom_call.1
= control target key start
LH: loop header
LB: loop body
LE: loop exit
PB: predicated region body
PF: predicated region fallthrough
CT: control target
= control target key end

     0   :  { %12 = vsyncpa [#allocation3], 0  ;;  %s2847_s0 = inlined_call_operand.vmem [shape: s32[16,1], index: 0, kind: input, shape index: {}]   ;;  %s2848_s1 = inlined_call_operand.hbm [shape: f32[240,256], index: 1, kind: input, shape index: {}]   ;;  %s2849_s2 = inlined_call_operand.vmem [shape: f32[2,2,32], index: 2, kind: input, shape index: {}]   ;;  %s2850_s3 = inlined_call_operand.vmem [shape: f32[2,2,32], index: 3, kind: input, shape index: {}]   ;;  %s2851_s4 = inlined_call_operand.hbm [shape: f32[16,128], index: 4, kind: output, shape index: {0}]   ;;  %s2852_s5 = inlined_call_operand.hbm [shape: f32[2,2,32], index: 5, kind: output, shape index: {1}]   ;;  %s2853_s6 = inlined_call_operand.hbm [shape: f32[2,2,32], index: 6, kind: output, shape index: {2}]  }
   0x1   :  { %13 = vsyncpa [#allocation4], 0 }
   0x2   :  { %14 = vsyncpa [#allocation7], 0  ;;  %s2451_s21 = smov [#allocation2]   ;;  %s2357_s25 = scalar_lea.hbm %s2848_s1, 7680 }
   0x3   :  { %s22_s22 = sshll.u32 %s2451_s21, 4  ;;  %p2358_p0 = scmp.ne.s32.totalorder %s2848_s1, %s2357_s25  ;;  %s23_s22 = int_to_ptr.vmem [resolvable:$true] %s22_s22 }
   0x4   :  { %p2361_p1 = scmp.lt.u32.totalorder %s2357_s25, %s2848_s1 }
   0x6   :  { %p2363_p2 = pnand %p2361_p1, %p2358_p0 }
   0x8   :  { %2366 = shalt.err (!%p2363_p2)
}
   0x9   :  { %s2367_s30 = scalar_lea.vmem %s23_s22, 7680  ;;  %p2372_p4 = scmp.lt.s32.totalorder %s23_s22, %s23_s22 }
   0xa   :  { %p2368_p3 = scmp.ne.s32.totalorder %s23_s22, %s2367_s30  ;;  %p2373_p5 = scmp.lt.s32.totalorder %s2367_s30, %s2367_s30 }
   0xc   :  { %p2374_p6 = por %p2373_p5, %p2372_p4 }
   0xe   :  { %p2375_p7 = pnand %p2374_p6, %p2368_p3 }
  0x10   :  { %2378 = shalt.err (!%p2375_p7)
}
  0x11   :  { %s2452_s7 = smov 256   ;;  %s2453_s8 = smov 16  }
  0x12   :  { %28 = dma.hbm_to_vmem [thread:$0]  %s2848_s1, 7680, %s23_s22, [#allocation3], %s2452_s7, %s2452_s7, %s2453_s8  }
  0x13   :  { %2445 = dma.done.wait [#allocation3], 7680  }
  0x14   :  { %2446 = vsyncadd [#allocation3], 4294959616  ;;  %v2454_v0 = vmov 0   ;;  %v91_v1 = vld [vmem:[%s2847_s0] sm:$0xff]  ;;  %v37_v3 = vld [vmem:[#allocation2 + $0x8] sm:$0xff]  ;;  %v2455_v7 = vmov 0.0  }
  0x15   :  { %2247 = vset.pattern.permute.xlu0 %v2454_v0  ;;  %2248 = vset.pattern.permute.xlu1 %v2454_v0  ;;  %v1842_v2 = vld [vmem:[%s2849_s2 + $0x2] sm:$0x3]  ;;  %v39_v4 = vld [vmem:[#allocation2 + $0x18] sm:$0xff]  ;;  %v38_v6 = vld [vmem:[#allocation2 + $0x10] sm:$0xff]  ;;  %s2456_s1 = smov 32   ;;  %vm199_vm1 = vcmask 261120  }
  0x16   :  { %96 = vperm.xlu0 %2247, %v91_v1   ;;  %v36_v5 = vld [vmem:[#allocation2] sm:$0xff]  ;;  %171 = vmatprep.mubr.f32.mxu0 %v2455_v7  ;;  %v2007_v8 = vpack.c.bf16 %v39_v4, %v37_v3  ;;  %v41_v10 = vld [vmem:[#allocation2 + $0x28] sm:$0xff]  ;;  %v43_v11 = vld [vmem:[#allocation2 + $0x38] sm:$0xff]  ;;  %vm209_vm2 = vcmask 523264   ;;  %s2458_s21 = smov 64   ;;  %vm2460_vm6 = vmmov 0  }
  0x17   :  { %v2009_v9 = vpack.c.bf16 %v38_v6, %v36_v5  ;;  %v40_v12 = vld [vmem:[#allocation2 + $0x20] sm:$0xff]  ;;  %277 = vmatprep.mubr.f32.mxu1 %v2455_v7  ;;  %v2011_v13 = vpack.c.bf16 %v43_v11, %v41_v10  ;;  %v42_v14 = vld [vmem:[#allocation2 + $0x30] sm:$0xff]  ;;  %v45_v15 = vld [vmem:[#allocation2 + $0x48] sm:$0xff]  ;;  %vm1589_vm7 = vcmask 254976  }
  0x18   :  { %v47_v16 = vld [vmem:[#allocation2 + $0x58] sm:$0xff]  ;;  %2008 = vmatprep.subr.bf16.mxu0 %v2007_v8  ;;  %v2013_v17 = vpack.c.bf16 %v42_v14, %v40_v12  ;;  %v44_v19 = vld [vmem:[#allocation2 + $0x40] sm:$0xff]  ;;  %v46_v20 = vld [vmem:[#allocation2 + $0x50] sm:$0xff]  ;;  %v93_v14 = vlaneseq }
  0x19   :  { %2010 = vmatpush1.bf16.msra.mxu0 %v2009_v9  ;;  %v2015_v18 = vpack.c.bf16 %v47_v16, %v45_v15  ;;  %v49_v21 = vld [vmem:[#allocation2 + $0x68] sm:$0xff]  ;;  %v51_v22 = vld [vmem:[#allocation2 + $0x78] sm:$0xff]  ;;  %v2017_v25 = vpack.c.bf16 %v46_v20, %v44_v19  ;;  %v68_v27 = vld [vmem:[#allocation2 + $0x100] sm:$0xff] }
  0x1a   :  { %196 = vrot.lane.b32.xlu0 %v1842_v2, %s2456_s1  ;;  %2012 = vmatprep.subr.bf16.mxu0 %v2011_v13  ;;  %v69_v23 = vld [vmem:[#allocation2 + $0x108] sm:$0xff]  ;;  %v71_v24 = vld [vmem:[#allocation2 + $0x118] sm:$0xff]  ;;  %v70_v28 = vld [vmem:[#allocation2 + $0x110] sm:$0xff]  ;;  %v2019_v29 = vpack.c.bf16 %v51_v22, %v49_v21  ;;  %v2553_v15 = vand.u32 127, %v93_v14 }
  0x1b   :  { %v2523_v26 = vpack.c.bf16 %v71_v24, %v69_v23  ;;  %v48_v30 = vld [vmem:[#allocation2 + $0x60] sm:$0xff]  ;;  %v50_v31 = vld [vmem:[#allocation2 + $0x70] sm:$0xff]  ;;  %v2525_v32 = vpack.c.bf16 %v70_v28, %v68_v27  ;;  %v73_v33 = vld [vmem:[#allocation2 + $0x128] sm:$0xff] }
  0x1c   :  { %v53_v34 = vld [vmem:[#allocation2 + $0x88] sm:$0xff]  ;;  %v55_v35 = vld [vmem:[#allocation2 + $0x98] sm:$0xff]  ;;  %v52_v37 = vld [vmem:[#allocation2 + $0x80] sm:$0xff]  ;;  %v2021_v41 = vpack.c.bf16 %v50_v31, %v48_v30  ;;  %vm191_vm4 = vcmp.lt.s32.totalorder %v2553_v15, 32 }
  0x1d   :  { %2014 = vmatpush1.bf16.msra.mxu0 %v2013_v17  ;;  %2040 = vmatprep.subr.bf16.mxu1 %v2523_v26  ;;  %v75_v36 = vld [vmem:[#allocation2 + $0x138] sm:$0xff]  ;;  %v72_v39 = vld [vmem:[#allocation2 + $0x120] sm:$0xff]  ;;  %v74_v40 = vld [vmem:[#allocation2 + $0x130] sm:$0xff]  ;;  %v2023_v46 = vpack.c.bf16 %v55_v35, %v53_v34  ;;  %v2457_v17 = vmov 1.0  }
  0x1e   :  { %2016 = vmatprep.subr.bf16.mxu0 %v2015_v18  ;;  %2042 = vmatpush1.bf16.msra.mxu1 %v2525_v32  ;;  %v2529_v38 = vpack.c.bf16 %v75_v36, %v73_v33  ;;  %v54_v42 = vld [vmem:[#allocation2 + $0x90] sm:$0xff]  ;;  %v2531_v43 = vpack.c.bf16 %v74_v40, %v72_v39  ;;  %v77_v44 = vld [vmem:[#allocation2 + $0x148] sm:$0xff]  ;;  %v79_v45 = vld [vmem:[#allocation2 + $0x158] sm:$0xff]  ;;  %v2584_v39 = vadd.s32 128, %v2553_v15 }
  0x1f   :  { %v57_v47 = vld [vmem:[#allocation2 + $0xa8] sm:$0xff]  ;;  %v59_v48 = vld [vmem:[#allocation2 + $0xb8] sm:$0xff]  ;;  %v2534_v49 = vpack.c.bf16 %v79_v45, %v77_v44  ;;  %v76_v50 = vld [vmem:[#allocation2 + $0x140] sm:$0xff]  ;;  %v2025_v55 = vpack.c.bf16 %v54_v42, %v52_v37 }
  0x20   :  { %2044 = vmatprep.subr.bf16.mxu1 %v2529_v38  ;;  %v78_v51 = vld [vmem:[#allocation2 + $0x150] sm:$0xff]  ;;  %v81_v52 = vld [vmem:[#allocation2 + $0x168] sm:$0xff]  ;;  %v83_v53 = vld [vmem:[#allocation2 + $0x178] sm:$0xff]  ;;  %v2027_v60 = vpack.c.bf16 %v59_v48, %v57_v47  ;;  %vm188_vm3 = vcmp.lt.s32.totalorder %v2584_v39, 192 }
  0x21   :  { %2018 = vmatpush1.bf16.msra.mxu0 %v2017_v25  ;;  %v2537_v54 = vpack.c.bf16 %v78_v51, %v76_v50  ;;  %v2540_v56 = vpack.c.bf16 %v83_v53, %v81_v52  ;;  %v80_v57 = vld [vmem:[#allocation2 + $0x160] sm:$0xff]  ;;  %v82_v58 = vld [vmem:[#allocation2 + $0x170] sm:$0xff]  ;;  %v61_v63 = vld [vmem:[#allocation2 + $0xc8] sm:$0xff] }
  0x22   :  { %2020 = vmatprep.subr.bf16.mxu0 %v2019_v29  ;;  %2046 = vmatpush1.bf16.msra.mxu1 %v2531_v43  ;;  %v1843_v59 = vld [vmem:[%s2850_s3 + $0x2] sm:$0x3]  ;;  %v58_v62 = vld [vmem:[#allocation2 + $0xb0] sm:$0xff]  ;;  %v63_v0 = vld [vmem:[#allocation2 + $0xd8] sm:$0xff]  ;;  %v2547_v1 = vpack.c.bf16 %v82_v58, %v80_v57 }
  0x23   :  { %2048 = vmatprep.subr.bf16.mxu1 %v2534_v49  ;;  %v56_v61 = vld [vmem:[#allocation2 + $0xa0] sm:$0xff]  ;;  %205 = vrot.lane.b32.xlu1 %v1843_v59, %s2456_s1  ;;  %v2031_v3 = vpack.c.bf16 %v63_v0, %v61_v63  ;;  %v62_v5 = vld [vmem:[#allocation2 + $0xd0] sm:$0xff]  ;;  %v65_v6 = vld [vmem:[#allocation2 + $0xe8] sm:$0xff] }
  0x24   :  { %v2029_v2 = vpack.c.bf16 %v58_v62, %v56_v61  ;;  %v60_v4 = vld [vmem:[#allocation2 + $0xc0] sm:$0xff]  ;;  %v67_v8 = vld [vmem:[#allocation2 + $0xf8] sm:$0xff]  ;;  %v66_v12 = vld [vmem:[#allocation2 + $0xf0] sm:$0xff] }
  0x25   :  { %2022 = vmatpush1.bf16.msra.mxu0 %v2021_v41  ;;  %v2033_v9 = vpack.c.bf16 %v62_v5, %v60_v4  ;;  %v2035_v10 = vpack.c.bf16 %v67_v8, %v65_v6  ;;  %v64_v11 = vld [vmem:[#allocation2 + $0xe0] sm:$0xff] }
  0x26   :  { %2024 = vmatprep.subr.bf16.mxu0 %v2023_v46  ;;  %2050 = vmatpush1.bf16.msra.mxu1 %v2537_v54  ;;  %v2037_v13 = vpack.c.bf16 %v66_v12, %v64_v11  ;;  %v192_v18 = vld [vmem:[%s2849_s2] sm:$0x3] }
  0x27   :  { %2052 = vmatprep.subr.bf16.mxu1 %v2540_v56  ;;  %v201_v19 = vld [vmem:[%s2850_s3] sm:$0x3] }
  0x29   :  { %2026 = vmatpush1.bf16.msra.mxu0 %v2025_v55 }
  0x2a   :  { %2028 = vmatprep.subr.bf16.mxu0 %v2027_v60  ;;  %2054 = vmatpush1.bf16.msra.mxu1 %v2547_v1 }
  0x2b   :  { %2056 = vmatprep.subr.bf16.mxu1 %v2523_v26 }
  0x2d   :  { %2030 = vmatpush1.bf16.msra.mxu0 %v2029_v2 }
  0x2e   :  { %2032 = vmatprep.subr.bf16.mxu0 %v2031_v3 }
  0x31   :  { %2034 = vmatpush1.bf16.msra.mxu0 %v2033_v9 }
  0x32   :  { %2036 = vmatprep.subr.bf16.mxu0 %v2035_v10 }
  0x35   :  { %2038 = vmatpush1.bf16.msra.mxu0 %v2037_v13 }
  0x95   :  { %v97_v16 = vpop.permute.xlu0 %96  ;;  %v206_v21 = vpop.permute.xlu1 %205 }
  0x96   :  { %vm101_vm0 = vcmp.eq.s32.totalorder %v2553_v15, %v97_v16  ;;  %v208_v23 = vsel %vm199_vm1, %v201_v19, %v206_v21 }
  0x97   :  { %1840 = vmatmul.mubr.msk.f32.vlgmr.msra.gmra.mrb[0].mxu0 %vm101_vm0, %v2457_v17  ;;  %301 = vrot.lane.b32.xlu1 %v208_v23, %s2458_s21 }
  0x98   :  { %177 = vmatprep.mubr.f32.mxu0 %v2455_v7 }
  0x99   :  { %v197_v20 = vpop.permute.xlu0 %196 }
  0x9a   :  { %v200_v22 = vsel %vm199_vm1, %v192_v18, %v197_v20 }
  0x9b   :  { %1844 = vmatmul.mubr.msk.f32.vlgmr.msra.gmra.mrb[0].mxu1 %vm209_vm2, %v200_v22 }
  0x9c   :  { %2058 = vmatpush1.bf16.msra.mxu1 %v2525_v32  ;;  %396 = vmatprep.mubr.f32.mxu1 %v2455_v7 }
  0x9d   :  { %2060 = vmatprep.subr.bf16.mxu1 %v2529_v38 }
  0xa0   :  { %2062 = vmatpush1.bf16.msra.mxu1 %v2531_v43 }
  0xa1   :  { %2064 = vmatprep.subr.bf16.mxu1 %v2534_v49 }
  0xa4   :  { %2066 = vmatpush1.bf16.msra.mxu1 %v2537_v54 }
  0xa5   :  { %2068 = vmatprep.subr.bf16.mxu1 %v2540_v56 }
  0xa8   :  { %2070 = vmatpush1.bf16.msra.mxu1 %v2547_v1 }
  0xa9   :  { %2078 = vmatprep.subr.bf16.mxu1 %v2523_v26 }
 0x109   :  { %v302_v46 = vpop.permute.xlu1 %301 }
 0x16a   :  { %v2577_v24 = vpop.f32.mrb[0].mxu0 }
 0x16b   :  { %v2579_v25 = vpop.f32.mrb[1].mxu0  ;;  %v325_v59 = vrot.slane %v2577_v24, 2 }
 0x16c   :  { %v326_v61 = vrot.slane %v2579_v25, 2 }
 0x16e   :  { %v279_v27 = vpop.f32.mrb[0].mxu1 }
 0x16f   :  { %v280_v28 = vadd.f32 %v279_v27, %v2577_v24  ;;  %v281_v29 = vpop.f32.mrb[1].mxu1  ;;  %v92_v27 = vld [vmem:[%s2847_s0 + $0x8] sm:$0xff]  ;;  %s2461_s0 = smov [#allocation6]  }
 0x170   :  { %v282_v30 = vadd.f32 %v281_v29, %v2579_v25  ;;  %v85_v29 = vld [vmem:[#allocation2 + $0x190] sm:$0xff]  ;;  %s1807_s22 = sshll.u32 %s2461_s0, 4  ;;  %s1808_s22 = int_to_ptr.vmem [resolvable:$true] %s1807_s22 }
 0x171   :  { %v1845_v31 = vmul.f32 -1.442695, %v280_v28  ;;  %v84_v28 = vld [vmem:[#allocation2 + $0x180] sm:$0xff]  ;;  %s2379_s23 = scalar_lea.vmem %s1808_s22, 64  ;;  %p2384_p9 = scmp.lt.s32.totalorder %s1808_s22, %s1808_s22 }
 0x172   :  { %v1846_v33 = vmul.f32 -1.442695, %v282_v30  ;;  %p2380_p8 = scmp.ne.s32.totalorder %s1808_s22, %s2379_s23  ;;  %p2385_p10 = scmp.lt.s32.totalorder %s2379_s23, %s2379_s23 }
 0x173   :  { %2249 = vpow2.f32 %v1845_v31  ;;  %v2614_v31 = vpack.c.bf16 %v85_v29, %v84_v28 }
 0x174   :  { %2251 = vpow2.f32 %v1846_v33  ;;  %v510_v33 = vrot.slane %v2577_v24, 4  ;;  %p2386_p11 = por %p2385_p10, %p2384_p9 }
 0x175   :  { %2253 = vtanh.f32 %v282_v30  ;;  %v2459_v30 = vmov 0.0|0.0  }
 0x176   :  { %2071 = vmatprep.subr.bf16.mxu0 %v2459_v30  ;;  %p2387_p12 = pnand %p2386_p11, %p2380_p8 }
 0x177   :  { %2073 = vmatpush3.bf16.msra.mxu0 %v2614_v31 }
 0x178   :  { %2074 = vmatprep.subr.bf16.mxu0 %v2459_v30 }
 0x17d   :  { %v2250_v34 = vpop.eup %2249 }
 0x17e   :  { %v2252_v35 = vpop.eup %2251  ;;  %v292_v36 = vadd.f32 1.0, %v2250_v34 }
 0x17f   :  { %v293_v37 = vadd.f32 1.0, %v2252_v35  ;;  %v2254_v40 = vpop.eup %2253  ;;  %v511_v35 = vrot.slane %v2579_v25, 4 }
 0x181   :  { %2255 = vrcp.f32 %v293_v37 }
 0x182   :  { %2257 = vrcp.f32 %v292_v36 }
 0x18b   :  { %v2256_v41 = vpop.eup %2255 }
 0x18c   :  { %v2258_v42 = vpop.eup %2257  ;;  %v299_v44 = vsel %vm188_vm3, %v2254_v40, %v2256_v41 }
 0x18d   :  { %v305_v45 = vmul.f32 %v2258_v42, %v299_v44  ;;  %v304_v47 = vmul.f32 %v2258_v42, %v302_v46 }
 0x18f   :  { %307 = vrot.lane.b32.xlu0 %v305_v45, %s2458_s21 }
 0x201   :  { %v308_v48 = vpop.permute.xlu0 %307 }
 0x202   :  { %v310_v50 = vadd.f32 %v308_v48, %v304_v47 }
 0x204   :  { %2259 = vtanh.f32 %v310_v50  ;;  %319 = vrot.lane.b32.xlu0 %v310_v50, %s2458_s21  ;;  %v86_v50 = vld [vmem:[#allocation2 + $0x1a0] sm:$0xff] }
 0x20e   :  { %v2260_v51 = vpop.eup %2259 }
 0x20f   :  { %v312_v52 = vmul.f32 %v2260_v51, %v299_v44  ;;  %v87_v51 = vld [vmem:[#allocation2 + $0x1b0] sm:$0xff] }
 0x211   :  { %314 = vrot.lane.b32.xlu1 %v312_v52, %s2458_s21  ;;  %v2624_v52 = vpack.c.bf16 %v87_v51, %v86_v50 }
 0x213   :  { %2076 = vmatpush3.bf16.msra.mxu0 %v2624_v52 }
 0x214   :  { %2093 = vmatprep.subr.bf16.mxu0 %v2459_v30 }
 0x276   :  { %v320_v53 = vpop.permute.xlu0 %319 }
 0x277   :  { %v322_v55 = vsel %vm191_vm4, %v320_v53, %v208_v23 }
 0x278   :  { %420 = vrot.lane.b32.xlu1 %v322_v55, %s2458_s21 }
 0x283   :  { %v315_v57 = vpop.permute.xlu1 %314 }
 0x284   :  { %v317_v58 = vsel %vm191_vm4, %v315_v57, %v200_v22 }
 0x285   :  { %1847 = vmatmul.mubr.msk.f32.vlgmr.msra.gmra.mrb[2].mxu1 %vm209_vm2, %v317_v58 }
 0x286   :  { %2080 = vmatpush1.bf16.msra.mxu1 %v2525_v32  ;;  %580 = vmatprep.mubr.f32.mxu1 %v2455_v7 }
 0x287   :  { %2082 = vmatprep.subr.bf16.mxu1 %v2529_v38 }
 0x28a   :  { %2084 = vmatpush1.bf16.msra.mxu1 %v2531_v43 }
 0x28b   :  { %2086 = vmatprep.subr.bf16.mxu1 %v2534_v49 }
 0x28e   :  { %2088 = vmatpush1.bf16.msra.mxu1 %v2537_v54 }
 0x28f   :  { %2090 = vmatprep.subr.bf16.mxu1 %v2540_v56 }
 0x292   :  { %2092 = vmatpush1.bf16.msra.mxu1 %v2547_v1 }
 0x293   :  { %2115 = vmatprep.subr.bf16.mxu1 %v2459_v30 }
 0x2ea   :  { %v421_v16 = vpop.permute.xlu1 %420 }
 0x358   :  { %v398_v60 = vpop.f32.mrb[2].mxu1 }
 0x359   :  { %v399_v62 = vadd.f32 %v398_v60, %v325_v59  ;;  %v400_v63 = vpop.f32.mrb[3].mxu1 }
 0x35a   :  { %v401_v0 = vadd.f32 %v400_v63, %v326_v61 }
 0x35b   :  { %v1848_v2 = vmul.f32 -1.442695, %v399_v62 }
 0x35c   :  { %v1849_v3 = vmul.f32 -1.442695, %v401_v0 }
 0x35d   :  { %2261 = vpow2.f32 %v1848_v2 }
 0x35e   :  { %2263 = vpow2.f32 %v1849_v3 }
 0x35f   :  { %2265 = vtanh.f32 %v401_v0 }
 0x367   :  { %v2262_v4 = vpop.eup %2261 }
 0x368   :  { %v2264_v5 = vpop.eup %2263  ;;  %v411_v6 = vadd.f32 1.0, %v2262_v4 }
 0x369   :  { %v412_v8 = vadd.f32 1.0, %v2264_v5  ;;  %v2266_v9 = vpop.eup %2265  ;;  %v2672_v5 = vld [vmem:[#allocation2 + $0x1c0] ss:$0 sm:$0xff] }
 0x36b   :  { %2267 = vrcp.f32 %v412_v8 }
 0x36c   :  { %2269 = vrcp.f32 %v411_v6 }
 0x375   :  { %v2268_v10 = vpop.eup %2267 }
 0x376   :  { %v2270_v11 = vpop.eup %2269  ;;  %v418_v12 = vsel %vm188_vm3, %v2266_v9, %v2268_v10 }
 0x377   :  { %v424_v13 = vmul.f32 %v2270_v11, %v418_v12  ;;  %v423_v18 = vmul.f32 %v2270_v11, %v421_v16 }
 0x379   :  { %426 = vrot.lane.b32.xlu0 %v424_v13, %s2458_s21  ;;  %v690_v13 = vrot.slane %v2577_v24, 6 }
 0x3eb   :  { %v427_v19 = vpop.permute.xlu0 %426 }
 0x3ec   :  { %v429_v20 = vadd.f32 %v427_v19, %v423_v18  ;;  %v691_v18 = vrot.slane %v2579_v25, 6 }
 0x3ee   :  { %2271 = vtanh.f32 %v429_v20 }
 0x3f8   :  { %v2272_v21 = vpop.eup %2271 }
 0x3f9   :  { %v431_v22 = vmul.f32 %v2272_v21, %v418_v12 }
 0x3fb   :  { %508 = vrot.lane.b32.xlu1 %v431_v22, %s2458_s21 }
 0x3ff   :  { %99 = vperm.xlu1 %2248, %v92_v27  }
 0x46d   :  { %v509_v23 = vpop.permute.xlu1 %508 }
 0x46e   :  { %1851 = vmatmul.mubr.msk.f32.vlgmr.msra.gmra.mrb[4].mxu1 %vm209_vm2, %v509_v23 }
 0x46f   :  { %2117 = vmatpush3.bf16.msra.mxu1 %v2614_v31  ;;  %1949 = vmatprep.mubr.msk.f32.mxu1 %vm2460_vm6, %v2455_v7 }
 0x470   :  { %2118 = vmatprep.subr.bf16.mxu1 %v2459_v30 }
 0x473   :  { %2120 = vmatpush3.bf16.msra.mxu1 %v2624_v52 }
 0x474   :  { %2122 = vmatprep.subr.bf16.mxu1 %v2523_v26 }
 0x47e   :  { %v100_v48 = vpop.permute.xlu1 %99 }
 0x47f   :  { %vm102_vm5 = vcmp.eq.s32.totalorder %v2553_v15, %v100_v48 }
 0x480   :  { %1841 = vmatmul.mubr.msk.f32.gmra.mrb[2].mxu0 %vm102_vm5, %v2457_v17 }
 0x481   :  { %1927 = vmatprep.mubr.msk.f32.mxu0 %vm2460_vm6, %v2455_v7 }
 0x541   :  { %v582_v34 = vpop.f32.mrb[4].mxu1 }
 0x542   :  { %v583_v36 = vadd.f32 %v582_v34, %v510_v33  ;;  %v584_v37 = vpop.f32.mrb[5].mxu1 }
 0x543   :  { %v585_v40 = vadd.f32 %v584_v37, %v511_v35 }
 0x544   :  { %v1852_v41 = vmul.f32 -1.442695, %v583_v36 }
 0x545   :  { %v1853_v42 = vmul.f32 -1.442695, %v585_v40 }
 0x546   :  { %2273 = vpow2.f32 %v1852_v41 }
 0x547   :  { %2275 = vpow2.f32 %v1853_v42 }
 0x548   :  { %2277 = vtanh.f32 %v585_v40 }
 0x550   :  { %v2274_v44 = vpop.eup %2273 }
 0x551   :  { %v2276_v45 = vpop.eup %2275  ;;  %v595_v46 = vadd.f32 1.0, %v2274_v44 }
 0x552   :  { %v596_v47 = vadd.f32 1.0, %v2276_v45  ;;  %v2278_v15 = vpop.eup %2277 }
 0x553   :  { %v2651_v0 = vpop.f32.mrb[2].mxu0 }
 0x554   :  { %2279 = vrcp.f32 %v596_v47  ;;  %v2653_v2 = vpop.f32.mrb[3].mxu0 }
 0x555   :  { %2281 = vrcp.f32 %v595_v46 }
 0x55e   :  { %v2280_v53 = vpop.eup %2279 }
 0x55f   :  { %v2282_v55 = vpop.eup %2281  ;;  %v602_v17 = vsel %vm188_vm3, %v2278_v15, %v2280_v53 }
 0x560   :  { %v604_v57 = vmul.f32 %v2282_v55, %v602_v17  ;;  %v603_v58 = vmul.f32 %v2282_v55, %v429_v20 }
 0x562   :  { %606 = vrot.lane.b32.xlu0 %v604_v57, %s2458_s21 }
 0x566   :  { %433 = vrot.lane.b32.xlu0 %v431_v22, %s2456_s1 }
 0x5d4   :  { %v607_v59 = vpop.permute.xlu0 %606 }
 0x5d5   :  { %v2639_v60 = vadd.f32 %v607_v59, %v603_v58 }
 0x5d7   :  { %2283 = vtanh.f32 %v2639_v60 }
 0x5d8   :  { %v434_v61 = vpop.permute.xlu0 %433 }
 0x5d9   :  { %1928 = vmatmul.mubr.msk.f32.vlgmr.msra.gmra.mrb[4].mxu0 %vm199_vm1, %v434_v61 }
 0x5da   :  { %2095 = vmatpush3.bf16.msra.mxu0 %v2614_v31  ;;  %1938 = vmatprep.mubr.msk.f32.mxu0 %vm2460_vm6, %v2455_v7 }
 0x5db   :  { %2096 = vmatprep.subr.bf16.mxu0 %v2459_v30 }
 0x5de   :  { %2098 = vmatpush3.bf16.msra.mxu0 %v2624_v52 }
 0x5df   :  { %2100 = vmatprep.subr.bf16.mxu0 %v2523_v26 }
 0x5e1   :  { %v2284_v62 = vpop.eup %2283 }
 0x5e2   :  { %v611_v63 = vmul.f32 %v2284_v62, %v602_v17 }
 0x5e4   :  { %688 = vrot.lane.b32.xlu0 %v611_v63, %s2458_s21  ;;  %613 = vrot.lane.b32.xlu1 %v611_v63, %s2456_s1 }
 0x656   :  { %v614_v3 = vpop.permute.xlu1 %613  ;;  %v689_v4 = vpop.permute.xlu0 %688 }
 0x657   :  { %1939 = vmatmul.mubr.msk.f32.vlgmr.msra.gmra.mrb[6].mxu0 %vm199_vm1, %v614_v3 }
 0x658   :  { %2102 = vmatpush1.bf16.msra.mxu0 %v2525_v32  ;;  %760 = vmatprep.mubr.f32.mxu0 %v2455_v7 }
 0x659   :  { %2104 = vmatprep.subr.bf16.mxu0 %v2529_v38 }
 0x65c   :  { %2106 = vmatpush1.bf16.msra.mxu0 %v2531_v43 }
 0x65d   :  { %2108 = vmatprep.subr.bf16.mxu0 %v2534_v49 }
 0x660   :  { %2110 = vmatpush1.bf16.msra.mxu0 %v2537_v54 }
 0x661   :  { %2112 = vmatprep.subr.bf16.mxu0 %v2540_v56 }
 0x664   :  { %2114 = vmatpush1.bf16.msra.mxu0 %v2547_v1 }
 0x665   :  { %2137 = vmatprep.subr.bf16.mxu0 %v2459_v30 }
 0x667   :  { %1855 = vmatmul.mubr.msk.f32.vlgmr.msra.gmra.mrb[8].mxu0 %vm209_vm2, %v689_v4 }
 0x668   :  { %2139 = vmatpush3.bf16.msra.mxu0 %v2614_v31  ;;  %1960 = vmatprep.mubr.msk.f32.mxu0 %vm2460_vm6, %v2455_v7 }
 0x669   :  { %2140 = vmatprep.subr.bf16.mxu0 %v2459_v30 }
 0x66c   :  { %2142 = vmatpush3.bf16.msra.mxu0 %v2624_v52 }
 0x66d   :  { %2144 = vmatprep.subr.bf16.mxu0 %v2523_v26 }
 0x6ac   :  { %v503_v6 = vpop.f32.mrb[4].mxu0 }
 0x6ad   :  { %v504_v8 = vadd.f32 %v503_v6, %v2672_v5  ;;  %v1929_v9 = vpop.f32.mrb[5].mxu0 }
 0x6af   :  { %507 = vst [vmem:[#allocation5] sm:$0x3] %v504_v8 }
 0x72a   :  { %v683_v10 = vpop.f32.mrb[6].mxu0 }
 0x72b   :  { %v684_v11 = vadd.f32 %v683_v10, %v2672_v5  ;;  %v1940_v12 = vpop.f32.mrb[7].mxu0 }
 0x72d   :  { %687 = vst [vmem:[#allocation5 + $0x2] sm:$0x3] %v684_v11 }
 0x73a   :  { %v762_v16 = vpop.f32.mrb[8].mxu0 }
 0x73b   :  { %v763_v19 = vadd.f32 %v762_v16, %v690_v13  ;;  %v764_v20 = vpop.f32.mrb[9].mxu0 }
 0x73c   :  { %v765_v21 = vadd.f32 %v764_v20, %v691_v18 }
 0x73d   :  { %v1856_v22 = vmul.f32 -1.442695, %v763_v19 }
 0x73e   :  { %v1857_v23 = vmul.f32 -1.442695, %v765_v21 }
 0x73f   :  { %2285 = vpow2.f32 %v1856_v22 }
 0x740   :  { %2287 = vpow2.f32 %v1857_v23  ;;  %v1049_v23 = vrot.slane %v2653_v2, 2 }
 0x741   :  { %2289 = vtanh.f32 %v765_v21  ;;  %v1048_v21 = vrot.slane %v2651_v0, 2 }
 0x749   :  { %v2286_v27 = vpop.eup %2285 }
 0x74a   :  { %v2288_v28 = vpop.eup %2287  ;;  %v775_v29 = vadd.f32 1.0, %v2286_v27 }
 0x74b   :  { %v776_v33 = vadd.f32 1.0, %v2288_v28  ;;  %v2290_v34 = vpop.eup %2289 }
 0x74d   :  { %2291 = vrcp.f32 %v776_v33 }
 0x74e   :  { %2293 = vrcp.f32 %v775_v29 }
 0x757   :  { %v2292_v35 = vpop.eup %2291 }
 0x758   :  { %v2294_v24 = vpop.eup %2293  ;;  %v782_v25 = vsel %vm188_vm3, %v2290_v34, %v2292_v35 }
 0x759   :  { %v784_v36 = vmul.f32 %v2294_v24, %v782_v25  ;;  %v783_v37 = vmul.f32 %v2294_v24, %v2639_v60 }
 0x75b   :  { %786 = vrot.lane.b32.xlu1 %v784_v36, %s2458_s21 }
 0x7cd   :  { %v787_v40 = vpop.permute.xlu1 %786 }
 0x7ce   :  { %v789_v41 = vadd.f32 %v787_v40, %v783_v37 }
 0x7d0   :  { %2295 = vtanh.f32 %v789_v41 }
 0x7da   :  { %v2296_v42 = vpop.eup %2295 }
 0x7db   :  { %v791_v44 = vmul.f32 %v2296_v42, %v782_v25 }
 0x7dd   :  { %868 = vrot.lane.b32.xlu1 %v791_v44, %s2458_s21  ;;  %793 = vrot.lane.b32.xlu0 %v791_v44, %s2456_s1 }
 0x84f   :  { %v794_v45 = vpop.permute.xlu0 %793  ;;  %v869_v46 = vpop.permute.xlu1 %868 }
 0x850   :  { %1950 = vmatmul.mubr.msk.f32.vlgmr.msra.gmra.mrb[6].mxu1 %vm199_vm1, %v794_v45 }
 0x851   :  { %2124 = vmatpush1.bf16.msra.mxu1 %v2525_v32  ;;  %936 = vmatprep.mubr.f32.mxu1 %v2455_v7 }
 0x852   :  { %2126 = vmatprep.subr.bf16.mxu1 %v2529_v38 }
 0x855   :  { %2128 = vmatpush1.bf16.msra.mxu1 %v2531_v43 }
 0x856   :  { %2130 = vmatprep.subr.bf16.mxu1 %v2534_v49 }
 0x859   :  { %2132 = vmatpush1.bf16.msra.mxu1 %v2537_v54 }
 0x85a   :  { %2134 = vmatprep.subr.bf16.mxu1 %v2540_v56 }
 0x85d   :  { %2136 = vmatpush1.bf16.msra.mxu1 %v2547_v1 }
 0x85e   :  { %2159 = vmatprep.subr.bf16.mxu1 %v2459_v30 }
 0x860   :  { %1859 = vmatmul.mubr.msk.f32.vlgmr.msra.gmra.mrb[8].mxu1 %vm209_vm2, %v869_v46 }
 0x861   :  { %2161 = vmatpush3.bf16.msra.mxu1 %v2614_v31  ;;  %1971 = vmatprep.mubr.msk.f32.mxu1 %vm2460_vm6, %v2455_v7 }
 0x862   :  { %2162 = vmatprep.subr.bf16.mxu1 %v2459_v30 }
 0x865   :  { %2164 = vmatpush3.bf16.msra.mxu1 %v2624_v52 }
 0x866   :  { %2166 = vmatprep.subr.bf16.mxu1 %v2523_v26 }
 0x923   :  { %v863_v47 = vpop.f32.mrb[6].mxu1 }
 0x924   :  { %v864_v48 = vadd.f32 %v863_v47, %v2672_v5  ;;  %v1951_v50 = vpop.f32.mrb[7].mxu1 }
 0x926   :  { %867 = vst [vmem:[#allocation5 + $0x4] sm:$0x3] %v864_v48 }
 0x933   :  { %v938_v51 = vpop.f32.mrb[8].mxu1 }
 0x934   :  { %v939_v15 = vadd.f32 %v938_v51, %v2651_v0  ;;  %v940_v53 = vpop.f32.mrb[9].mxu1 }
 0x935   :  { %v941_v55 = vadd.f32 %v940_v53, %v2653_v2 }
 0x936   :  { %v1860_v17 = vmul.f32 -1.442695, %v939_v15 }
 0x937   :  { %v1861_v57 = vmul.f32 -1.442695, %v941_v55 }
 0x938   :  { %2297 = vpow2.f32 %v1860_v17 }
 0x939   :  { %2299 = vpow2.f32 %v1861_v57  ;;  %v1228_v57 = vrot.slane %v2651_v0, 4 }
 0x93a   :  { %2301 = vtanh.f32 %v941_v55 }
 0x942   :  { %v2298_v58 = vpop.eup %2297 }
 0x943   :  { %v2300_v59 = vpop.eup %2299  ;;  %v951_v60 = vadd.f32 1.0, %v2298_v58 }
 0x944   :  { %v952_v61 = vadd.f32 1.0, %v2300_v59  ;;  %v2302_v62 = vpop.eup %2301  ;;  %v1229_v59 = vrot.slane %v2653_v2, 4 }
 0x946   :  { %2303 = vrcp.f32 %v952_v61 }
 0x947   :  { %2305 = vrcp.f32 %v951_v60 }
 0x950   :  { %v2304_v63 = vpop.eup %2303 }
 0x951   :  { %v2306_v3 = vpop.eup %2305  ;;  %v958_v4 = vsel %vm188_vm3, %v2302_v62, %v2304_v63 }
 0x952   :  { %v960_v6 = vmul.f32 %v2306_v3, %v958_v4  ;;  %v959_v8 = vmul.f32 %v2306_v3, %v789_v41 }
 0x954   :  { %962 = vrot.lane.b32.xlu0 %v960_v6, %s2458_s21 }
 0x9c6   :  { %v963_v9 = vpop.permute.xlu0 %962 }
 0x9c7   :  { %v965_v10 = vadd.f32 %v963_v9, %v959_v8 }
 0x9c9   :  { %2307 = vtanh.f32 %v965_v10 }
 0x9d3   :  { %v2308_v11 = vpop.eup %2307 }
 0x9d4   :  { %v967_v12 = vmul.f32 %v2308_v11, %v958_v4 }
 0x9d6   :  { %1044 = vrot.lane.b32.xlu0 %v967_v12, %s2458_s21  ;;  %969 = vrot.lane.b32.xlu1 %v967_v12, %s2456_s1 }
 0xa48   :  { %v970_v13 = vpop.permute.xlu1 %969  ;;  %v1045_v16 = vpop.permute.xlu0 %1044 }
 0xa49   :  { %1961 = vmatmul.mubr.msk.f32.vlgmr.msra.gmra.mrb[10].mxu0 %vm199_vm1, %v970_v13 }
 0xa4a   :  { %2146 = vmatpush1.bf16.msra.mxu0 %v2525_v32  ;;  %1118 = vmatprep.mubr.f32.mxu0 %v2455_v7 }
 0xa4b   :  { %2148 = vmatprep.subr.bf16.mxu0 %v2529_v38 }
 0xa4e   :  { %2150 = vmatpush1.bf16.msra.mxu0 %v2531_v43 }
 0xa4f   :  { %2152 = vmatprep.subr.bf16.mxu0 %v2534_v49 }
 0xa52   :  { %2154 = vmatpush1.bf16.msra.mxu0 %v2537_v54 }
 0xa53   :  { %2156 = vmatprep.subr.bf16.mxu0 %v2540_v56 }
 0xa56   :  { %2158 = vmatpush1.bf16.msra.mxu0 %v2547_v1 }
 0xa57   :  { %2181 = vmatprep.subr.bf16.mxu0 %v2459_v30 }
 0xa59   :  { %1863 = vmatmul.mubr.msk.f32.vlgmr.msra.gmra.mrb[12].mxu0 %vm209_vm2, %v1045_v16 }
 0xa5a   :  { %2183 = vmatpush3.bf16.msra.mxu0 %v2614_v31  ;;  %1982 = vmatprep.mubr.msk.f32.mxu0 %vm2460_vm6, %v2455_v7 }
 0xa5b   :  { %2184 = vmatprep.subr.bf16.mxu0 %v2459_v30 }
 0xa5e   :  { %2186 = vmatpush3.bf16.msra.mxu0 %v2624_v52 }
 0xa5f   :  { %2188 = vmatprep.subr.bf16.mxu0 %v2523_v26 }
 0xb1c   :  { %v1039_v18 = vpop.f32.mrb[10].mxu0 }
 0xb1d   :  { %v1040_v19 = vadd.f32 %v1039_v18, %v2672_v5  ;;  %v1962_v20 = vpop.f32.mrb[11].mxu0 }
 0xb1f   :  { %1043 = vst [vmem:[#allocation5 + $0x6] sm:$0x3] %v1040_v19 }
 0xb2c   :  { %v1120_v22 = vpop.f32.mrb[12].mxu0 }
 0xb2d   :  { %v1121_v27 = vadd.f32 %v1120_v22, %v1048_v21  ;;  %v1122_v28 = vpop.f32.mrb[13].mxu0 }
 0xb2e   :  { %v1123_v29 = vadd.f32 %v1122_v28, %v1049_v23 }
 0xb2f   :  { %v1864_v33 = vmul.f32 -1.442695, %v1121_v27 }
 0xb30   :  { %v1865_v34 = vmul.f32 -1.442695, %v1123_v29 }
 0xb31   :  { %2309 = vpow2.f32 %v1864_v33  ;;  %v1408_v33 = vrot.slane %v2651_v0, 6 }
 0xb32   :  { %2311 = vpow2.f32 %v1865_v34 }
 0xb33   :  { %2313 = vtanh.f32 %v1123_v29 }
 0xb3b   :  { %v2310_v35 = vpop.eup %2309 }
 0xb3c   :  { %v2312_v24 = vpop.eup %2311  ;;  %v1133_v25 = vadd.f32 1.0, %v2310_v35  ;;  %v1409_v35 = vrot.slane %v2653_v2, 6 }
 0xb3d   :  { %v1134_v36 = vadd.f32 1.0, %v2312_v24  ;;  %v2314_v37 = vpop.eup %2313 }
 0xb3f   :  { %2315 = vrcp.f32 %v1134_v36 }
 0xb40   :  { %2317 = vrcp.f32 %v1133_v25 }
 0xb49   :  { %v2316_v40 = vpop.eup %2315 }
 0xb4a   :  { %v2318_v41 = vpop.eup %2317  ;;  %v1140_v42 = vsel %vm188_vm3, %v2314_v37, %v2316_v40 }
 0xb4b   :  { %v1142_v44 = vmul.f32 %v2318_v41, %v1140_v42  ;;  %v1141_v45 = vmul.f32 %v2318_v41, %v965_v10 }
 0xb4d   :  { %1144 = vrot.lane.b32.xlu1 %v1142_v44, %s2458_s21 }
 0xbbf   :  { %v1145_v46 = vpop.permute.xlu1 %1144 }
 0xbc0   :  { %v1147_v47 = vadd.f32 %v1145_v46, %v1141_v45 }
 0xbc2   :  { %2319 = vtanh.f32 %v1147_v47 }
 0xbcc   :  { %v2320_v48 = vpop.eup %2319 }
 0xbcd   :  { %v1149_v50 = vmul.f32 %v2320_v48, %v1140_v42 }
 0xbcf   :  { %1226 = vrot.lane.b32.xlu1 %v1149_v50, %s2458_s21  ;;  %1151 = vrot.lane.b32.xlu0 %v1149_v50, %s2456_s1 }
 0xc41   :  { %v1152_v51 = vpop.permute.xlu0 %1151  ;;  %v1227_v15 = vpop.permute.xlu1 %1226 }
 0xc42   :  { %1972 = vmatmul.mubr.msk.f32.vlgmr.msra.gmra.mrb[10].mxu1 %vm199_vm1, %v1152_v51 }
 0xc43   :  { %2168 = vmatpush1.bf16.msra.mxu1 %v2525_v32  ;;  %1298 = vmatprep.mubr.f32.mxu1 %v2455_v7 }
 0xc44   :  { %2170 = vmatprep.subr.bf16.mxu1 %v2529_v38 }
 0xc47   :  { %2172 = vmatpush1.bf16.msra.mxu1 %v2531_v43 }
 0xc48   :  { %2174 = vmatprep.subr.bf16.mxu1 %v2534_v49 }
 0xc4b   :  { %2176 = vmatpush1.bf16.msra.mxu1 %v2537_v54 }
 0xc4c   :  { %2178 = vmatprep.subr.bf16.mxu1 %v2540_v56 }
 0xc4f   :  { %2180 = vmatpush1.bf16.msra.mxu1 %v2547_v1 }
 0xc50   :  { %2203 = vmatprep.subr.bf16.mxu1 %v2459_v30 }
 0xc52   :  { %1867 = vmatmul.mubr.msk.f32.vlgmr.msra.gmra.mrb[12].mxu1 %vm209_vm2, %v1227_v15 }
 0xc53   :  { %2205 = vmatpush3.bf16.msra.mxu1 %v2614_v31  ;;  %1993 = vmatprep.mubr.msk.f32.mxu1 %vm2460_vm6, %v2455_v7 }
 0xc54   :  { %2206 = vmatprep.subr.bf16.mxu1 %v2459_v30 }
 0xc57   :  { %2208 = vmatpush3.bf16.msra.mxu1 %v2624_v52 }
 0xc58   :  { %2210 = vmatprep.subr.bf16.mxu1 %v2523_v26 }
 0xd15   :  { %v1221_v53 = vpop.f32.mrb[10].mxu1 }
 0xd16   :  { %v1222_v55 = vadd.f32 %v1221_v53, %v2672_v5  ;;  %v1973_v17 = vpop.f32.mrb[11].mxu1 }
 0xd18   :  { %1225 = vst [vmem:[#allocation5 + $0x8] sm:$0x3] %v1222_v55 }
 0xd25   :  { %v1300_v58 = vpop.f32.mrb[12].mxu1 }
 0xd26   :  { %v1301_v60 = vadd.f32 %v1300_v58, %v1228_v57  ;;  %v1302_v61 = vpop.f32.mrb[13].mxu1  ;;  %v90_v57 = vld [vmem:[#allocation2 + $0x1d0] ss:$8 sm:$0x3] }
 0xd27   :  { %v1303_v62 = vadd.f32 %v1302_v61, %v1229_v59 }
 0xd28   :  { %v1868_v63 = vmul.f32 -1.442695, %v1301_v60 }
 0xd29   :  { %v1869_v3 = vmul.f32 -1.442695, %v1303_v62 }
 0xd2a   :  { %2321 = vpow2.f32 %v1868_v63 }
 0xd2b   :  { %2323 = vpow2.f32 %v1869_v3 }
 0xd2c   :  { %2325 = vtanh.f32 %v1303_v62 }
 0xd34   :  { %v2322_v4 = vpop.eup %2321 }
 0xd35   :  { %v2324_v6 = vpop.eup %2323  ;;  %v1313_v26 = vadd.f32 1.0, %v2322_v4 }
 0xd36   :  { %v1314_v8 = vadd.f32 1.0, %v2324_v6  ;;  %v2326_v9 = vpop.eup %2325 }
 0xd38   :  { %2327 = vrcp.f32 %v1314_v8 }
 0xd39   :  { %2329 = vrcp.f32 %v1313_v26 }
 0xd42   :  { %v2328_v10 = vpop.eup %2327 }
 0xd43   :  { %v2330_v11 = vpop.eup %2329  ;;  %v1320_v12 = vsel %vm188_vm3, %v2326_v9, %v2328_v10 }
 0xd44   :  { %v1322_v13 = vmul.f32 %v2330_v11, %v1320_v12  ;;  %v1321_v16 = vmul.f32 %v2330_v11, %v1147_v47 }
 0xd46   :  { %1324 = vrot.lane.b32.xlu0 %v1322_v13, %s2458_s21 }
 0xdb8   :  { %v1325_v18 = vpop.permute.xlu0 %1324 }
 0xdb9   :  { %v1327_v19 = vadd.f32 %v1325_v18, %v1321_v16 }
 0xdbb   :  { %2331 = vtanh.f32 %v1327_v19 }
 0xdc5   :  { %v2332_v20 = vpop.eup %2331 }
 0xdc6   :  { %v1329_v21 = vmul.f32 %v2332_v20, %v1320_v12 }
 0xdc8   :  { %1406 = vrot.lane.b32.xlu0 %v1329_v21, %s2458_s21  ;;  %1331 = vrot.lane.b32.xlu1 %v1329_v21, %s2456_s1 }
 0xe3a   :  { %v1332_v22 = vpop.permute.xlu1 %1331  ;;  %v1407_v23 = vpop.permute.xlu0 %1406 }
 0xe3b   :  { %1983 = vmatmul.mubr.msk.f32.vlgmr.msra.gmra.mrb[14].mxu0 %vm199_vm1, %v1332_v22 }
 0xe3c   :  { %2190 = vmatpush1.bf16.msra.mxu0 %v2525_v32  ;;  %1478 = vmatprep.mubr.f32.mxu0 %v2455_v7 }
 0xe3d   :  { %2192 = vmatprep.subr.bf16.mxu0 %v2529_v38 }
 0xe40   :  { %2194 = vmatpush1.bf16.msra.mxu0 %v2531_v43 }
 0xe41   :  { %2196 = vmatprep.subr.bf16.mxu0 %v2534_v49 }
 0xe44   :  { %2198 = vmatpush1.bf16.msra.mxu0 %v2537_v54 }
 0xe45   :  { %2200 = vmatprep.subr.bf16.mxu0 %v2540_v56 }
 0xe48   :  { %2202 = vmatpush1.bf16.msra.mxu0 %v2547_v1 }
 0xe49   :  { %2225 = vmatprep.subr.bf16.mxu0 %v2459_v30 }
 0xe4b   :  { %1871 = vmatmul.mubr.msk.f32.vlgmr.msra.gmra.mrb[16].mxu0 %vm209_vm2, %v1407_v23 }
 0xe4c   :  { %2227 = vmatpush3.bf16.msra.mxu0 %v2614_v31  ;;  %2004 = vmatprep.mubr.msk.f32.mxu0 %vm2460_vm6, %v2455_v7 }
 0xe4d   :  { %2228 = vmatprep.subr.bf16.mxu0 %v2459_v30 }
 0xe50   :  { %2230 = vmatpush3.bf16.msra.mxu0 %v2624_v52 }
 0xf0e   :  { %v1401_v27 = vpop.f32.mrb[14].mxu0 }
 0xf0f   :  { %v1402_v28 = vadd.f32 %v1401_v27, %v2672_v5  ;;  %v1984_v29 = vpop.f32.mrb[15].mxu0 }
 0xf11   :  { %1405 = vst [vmem:[#allocation5 + $0xa] sm:$0x3] %v1402_v28 }
 0xf1e   :  { %v1480_v34 = vpop.f32.mrb[16].mxu0 }
 0xf1f   :  { %v1481_v24 = vadd.f32 %v1480_v34, %v1408_v33  ;;  %v1482_v25 = vpop.f32.mrb[17].mxu0 }
 0xf20   :  { %v1483_v31 = vadd.f32 %v1482_v25, %v1409_v35 }
 0xf21   :  { %v1872_v36 = vmul.f32 -1.442695, %v1481_v24 }
 0xf22   :  { %v1873_v37 = vmul.f32 -1.442695, %v1483_v31 }
 0xf23   :  { %2333 = vpow2.f32 %v1872_v36 }
 0xf24   :  { %2335 = vpow2.f32 %v1873_v37 }
 0xf25   :  { %2337 = vtanh.f32 %v1483_v31 }
 0xf2d   :  { %v2334_v30 = vpop.eup %2333 }
 0xf2e   :  { %v2336_v40 = vpop.eup %2335  ;;  %v1493_v52 = vadd.f32 1.0, %v2334_v30 }
 0xf2f   :  { %v1494_v41 = vadd.f32 1.0, %v2336_v40  ;;  %v2338_v42 = vpop.eup %2337 }
 0xf31   :  { %2339 = vrcp.f32 %v1494_v41 }
 0xf32   :  { %2341 = vrcp.f32 %v1493_v52 }
 0xf3b   :  { %v2340_v44 = vpop.eup %2339 }
 0xf3c   :  { %v2342_v0 = vpop.eup %2341  ;;  %v1500_v2 = vsel %vm188_vm3, %v2338_v42, %v2340_v44 }
 0xf3d   :  { %v1502_v45 = vmul.f32 %v2342_v0, %v1500_v2  ;;  %v1501_v46 = vmul.f32 %v2342_v0, %v1327_v19 }
 0xf3f   :  { %1504 = vrot.lane.b32.xlu1 %v1502_v45, %s2458_s21 }
 0xfb1   :  { %v1505_v47 = vpop.permute.xlu1 %1504 }
 0xfb2   :  { %v1507_v48 = vadd.f32 %v1505_v47, %v1501_v46 }
 0xfb4   :  { %2343 = vtanh.f32 %v1507_v48 }
 0xfbe   :  { %v2344_v50 = vpop.eup %2343 }
 0xfbf   :  { %v1509_v51 = vmul.f32 %v2344_v50, %v1500_v2 }
 0xfc1   :  { %1586 = vrot.lane.b32.xlu1 %v1509_v51, %s2458_s21  ;;  %1511 = vrot.lane.b32.xlu0 %v1509_v51, %s2456_s1 }
0x1033   :  { %v1587_v15 = vpop.permute.xlu1 %1586  ;;  %v1512_v53 = vpop.permute.xlu0 %1511 }
0x1034   :  { %1590 = vst.msk [vmem:[#allocation6] sm:$0x3] %vm1589_vm7, %v1587_v15  ;;  %1994 = vmatmul.mubr.msk.f32.vlgmr.msra.gmra.mrb[14].mxu1 %vm199_vm1, %v1512_v53 }
0x1035   :  { %2212 = vmatpush1.bf16.msra.mxu1 %v2525_v32  ;;  %1673 = vmatprep.mubr.f32.mxu1 %v2455_v7  ;;  %v1598_v7 = vshrl.u32 %v93_v14, 7 }
0x1036   :  { %2214 = vmatprep.subr.bf16.mxu1 %v2529_v38 }
0x1037   :  { %v1599_v38 = vsub.s32 0, %v1598_v7 }
0x1039   :  { %2216 = vmatpush1.bf16.msra.mxu1 %v2531_v43  ;;  %v1603_v43 = vsub.s32 1, %v1598_v7  ;;  %v1600_v58 = vrot.slane %v90_v57, %v1599_v38 }
0x103a   :  { %2218 = vmatprep.subr.bf16.mxu1 %v2534_v49 }
0x103b   :  { %v1604_v49 = vrot.slane %v90_v57, %v1603_v43 }
0x103d   :  { %2220 = vmatpush1.bf16.msra.mxu1 %v2537_v54 }
0x103e   :  { %2222 = vmatprep.subr.bf16.mxu1 %v2540_v56 }
0x1041   :  { %2224 = vmatpush1.bf16.msra.mxu1 %v2547_v1 }
0x1044   :  { %1875 = vmatmul.mubr.msk.f32.vlgmr.msra.gmra.mrb[16].mxu1 %vm209_vm2, %v1587_v15 }
0x1107   :  { %v1581_v55 = vpop.f32.mrb[14].mxu1 }
0x1108   :  { %v1582_v17 = vadd.f32 %v1581_v55, %v2672_v5  ;;  %v1995_v32 = vpop.f32.mrb[15].mxu1 }
0x110a   :  { %1585 = vst [vmem:[#allocation5 + $0xc] sm:$0x3] %v1582_v17 }
0x1117   :  { %v1675_v59 = vpop.f32.mrb[16].mxu1 }
0x1118   :  { %v1676_v54 = vadd.f32 %v1675_v59, %v1600_v58  ;;  %v1677_v60 = vpop.f32.mrb[17].mxu1 }
0x1119   :  { %v1678_v56 = vadd.f32 %v1677_v60, %v1604_v49 }
0x111a   :  { %v1876_v61 = vmul.f32 -1.442695, %v1676_v54 }
0x111b   :  { %v1877_v1 = vmul.f32 -1.442695, %v1678_v56 }
0x111c   :  { %2345 = vpow2.f32 %v1876_v61 }
0x111d   :  { %2347 = vpow2.f32 %v1877_v1 }
0x111e   :  { %2349 = vtanh.f32 %v1678_v56 }
0x1126   :  { %v2346_v62 = vpop.eup %2345 }
0x1127   :  { %v2348_v63 = vpop.eup %2347  ;;  %v1688_v3 = vadd.f32 1.0, %v2346_v62 }
0x1128   :  { %v1689_v4 = vadd.f32 1.0, %v2348_v63  ;;  %v2350_v14 = vpop.eup %2349 }
0x112a   :  { %2351 = vrcp.f32 %v1689_v4 }
0x112b   :  { %2353 = vrcp.f32 %v1688_v3 }
0x1134   :  { %v2352_v6 = vpop.eup %2351 }
0x1135   :  { %v2354_v26 = vpop.eup %2353  ;;  %v1695_v8 = vsel %vm188_vm3, %v2350_v14, %v2352_v6 }
0x1136   :  { %v1697_v9 = vmul.f32 %v2354_v26, %v1695_v8  ;;  %v1696_v10 = vmul.f32 %v2354_v26, %v1507_v48 }
0x1138   :  { %1699 = vrot.lane.b32.xlu0 %v1697_v9, %s2458_s21 }
0x113c   :  { %1592 = vrot.lane.b32.xlu0 %v1507_v48, %s2458_s21 }
0x11aa   :  { %v1700_v11 = vpop.permute.xlu0 %1699 }
0x11ab   :  { %v1702_v12 = vadd.f32 %v1700_v11, %v1696_v10 }
0x11ad   :  { %2355 = vtanh.f32 %v1702_v12 }
0x11ae   :  { %v1593_v13 = vpop.permute.xlu0 %1592 }
0x11af   :  { %1595 = vst.msk [vmem:[#allocation8] sm:$0x3] %vm1589_vm7, %v1593_v13 }
0x11b7   :  { %v2356_v16 = vpop.eup %2355 }
0x11b8   :  { %v1704_v18 = vmul.f32 %v2356_v16, %v1695_v8 }
0x11ba   :  { %1706 = vrot.lane.b32.xlu1 %v1704_v18, %s2456_s1 }
0x11be   :  { %1785 = vrot.lane.b32.xlu1 %v1702_v12, %s2456_s1 }
0x122c   :  { %v1707_v39 = vpop.permute.xlu1 %1706 }
0x122d   :  { %1783 = vst.msk [vmem:[#allocation6 + $0x2] sm:$0x3] %vm1589_vm7, %v1707_v39  ;;  %2005 = vmatmul.mubr.msk.f32.vlgmr.msra.gmra.mrb[18].mxu0 %vm199_vm1, %v1707_v39 }
0x1230   :  { %v1786_v19 = vpop.permute.xlu1 %1785 }
0x1231   :  { %1789 = vst.msk [vmem:[#allocation8 + $0x2] sm:$0x3] %vm1589_vm7, %v1786_v19 }
0x1232   :  { %2390 = shalt.err (!%p2387_p12)
}
0x1233   :  { %s2391_s26 = scalar_lea.hbm %s2852_s5, 64 }
0x1234   :  { %p2392_p13 = scmp.ne.s32.totalorder %s2852_s5, %s2391_s26  ;;  %p2395_p0 = scmp.lt.u32.totalorder %s2391_s26, %s2852_s5 }
0x1236   :  { %p2397_p1 = pnand %p2395_p0, %p2392_p13 }
0x1238   :  { %2400 = shalt.err (!%p2397_p1)
}
0x1239   :  { %s2462_s7 = smov 2   ;;  %s2463_s10 = smov [#allocation8]  }
0x123a   :  { %1813 = dma.vmem_to_hbm [thread:$0]  %s1808_s22, 64, %s2852_s5, [#allocation7], %s2456_s1, %s2456_s1, %s2462_s7  }
0x123b   :  { %s1819_s11 = sshll.u32 %s2463_s10, 4  ;;  %s1820_s11 = int_to_ptr.vmem [resolvable:$true] %s1819_s11 }
0x123c   :  { %s2401_s12 = scalar_lea.vmem %s1820_s11, 64  ;;  %p2406_p3 = scmp.lt.s32.totalorder %s1820_s11, %s1820_s11 }
0x123d   :  { %p2402_p2 = scmp.ne.s32.totalorder %s1820_s11, %s2401_s12  ;;  %p2407_p4 = scmp.lt.s32.totalorder %s2401_s12, %s2401_s12 }
0x123f   :  { %p2408_p5 = por %p2407_p4, %p2406_p3 }
0x1241   :  { %p2409_p6 = pnand %p2408_p5, %p2402_p2 }
0x1243   :  { %2412 = shalt.err (!%p2409_p6)
}
0x1244   :  { %s2413_s15 = scalar_lea.hbm %s2853_s6, 64 }
0x1245   :  { %p2414_p7 = scmp.ne.s32.totalorder %s2853_s6, %s2413_s15  ;;  %p2417_p8 = scmp.lt.u32.totalorder %s2413_s15, %s2853_s6 }
0x1247   :  { %p2419_p9 = pnand %p2417_p8, %p2414_p7 }
0x1249   :  { %2422 = shalt.err (!%p2419_p9)
}
0x124a   :  { %1825 = dma.vmem_to_hbm [thread:$0]  %s1820_s11, 64, %s2853_s6, [#allocation7], %s2456_s1, %s2456_s1, %s2462_s7  }
0x124b   :  { %s2464_s21 = smov [#allocation5]  }
0x124c   :  { %s1795_s2 = sshll.u32 %s2464_s21, 4  ;;  %s1796_s2 = int_to_ptr.vmem [resolvable:$true] %s1795_s2 }
0x124d   :  { %s2423_s3 = scalar_lea.vmem %s1796_s2, 256  ;;  %p2428_p11 = scmp.lt.s32.totalorder %s1796_s2, %s1796_s2 }
0x124e   :  { %p2424_p10 = scmp.ne.s32.totalorder %s1796_s2, %s2423_s3  ;;  %p2429_p12 = scmp.lt.s32.totalorder %s2423_s3, %s2423_s3 }
0x1250   :  { %p2430_p13 = por %p2429_p12, %p2428_p11 }
0x1252   :  { %p2431_p0 = pnand %p2430_p13, %p2424_p10 }
0x1300   :  { %v1776_v20 = vpop.f32.mrb[18].mxu0 }
0x1301   :  { %v1777_v21 = vadd.f32 %v1776_v20, %v2672_v5  ;;  %v2006_v22 = vpop.f32.mrb[19].mxu0 }
0x1303   :  { %1780 = vst [vmem:[#allocation5 + $0xe] sm:$0x3] %v1777_v21 }
0x1304   :  { %2434 = shalt.err (!%p2431_p0)
}
0x1305   :  { %s2435_s23 = scalar_lea.hbm %s2851_s4, 256 }
0x1306   :  { %p2436_p1 = scmp.ne.s32.totalorder %s2851_s4, %s2435_s23  ;;  %p2439_p2 = scmp.lt.u32.totalorder %s2435_s23, %s2851_s4 }
0x1308   :  { %p2441_p3 = pnand %p2439_p2, %p2436_p1 }
0x130a   :  { %2444 = shalt.err (!%p2441_p3)
}
0x130b   :  { %s2465_s26 = smov 128   ;;  %s2466_s27 = smov 8  }
0x130c   :  { %1801 = dma.vmem_to_hbm [thread:$0]  %s1796_s2, 256, %s2851_s4, [#allocation4], %s2465_s26, %s2465_s26, %s2466_s27  }
0x130d   :  { %2447 = dma.done.wait [#allocation4], 256  }
0x130e   :  { %2448 = vsyncadd [#allocation4], 4294967040 }
0x130f   :  { %2449 = dma.done.wait [#allocation7], 128  }
0x1310   :  { %2450 = vsyncadd [#allocation7], 4294967168 }
0x1311   :  { %1835 = vsyncpa [#allocation3], 1 }
0x1312   :  { %1836 = vsyncpa [#allocation4], 1 }
0x1313   :  { %1837 = vsyncpa [#allocation7], 1 }

</bundles_post_ra>
